<compile_context>
chip_gen: v7x
topology: tpu7x:2x2x1
jax: 0.10.0
libtpu: 0.0.40
codegen_flags: <defaults>
</compile_context>

<pallas_src>
import functools

import jax
import jax.numpy as jnp
from jax import lax
from jax.experimental import pallas as pl
from jax.experimental.pallas import tpu as pltpu

F32 = jnp.float32

NODES = ("user", "item", "taste", "image")
EDGES = (
    ("taste", "associated_with", "item"),
    ("image", "associated_with", "item"),
    ("user", "buys", "item"),
    ("item", "bought_by", "user"),
)


# --------------------------------------------------------------------------
# Fused kernel: BN + (dropout=id) + HGT-style attention + output linear + ReLU
# --------------------------------------------------------------------------
def _fusion_gat_kernel(
    xu_ref, xi_ref, xt_ref, xg_ref,                 # node features
    gamma_ref, beta_ref,                            # shared BatchNorm affine
    wu_ref, bu_ref, wi_ref, bi_ref,                 # fused QKV weights/biases
    wt_ref, bt_ref, wg_ref, bg_ref,
    ow_i_ref, ob_i_ref, ow_u_ref, ob_u_ref,         # per-destination output linear
    alpha_i_ref, alpha_u_ref,                       # sigmoid(skip) gates, shape (1,1)
    m_ti_ref, m_gi_ref, m_ui_ref, m_iu_ref,         # dense {0,1} adjacency masks
    ou_ref, oi_ref, ot_ref, og_ref,                 # outputs
    *, heads,
):
    H = xu_ref.shape[1]
    gamma = gamma_ref[...]
    beta = beta_ref[...]

    def bnorm(x):
        # BatchNorm1d, training-mode statistics (biased variance), per node type.
        mu = jnp.mean(x, axis=0, keepdims=True)
        var = jnp.mean((x - mu) ** 2, axis=0, keepdims=True)
        return (x - mu) * lax.rsqrt(var + 1e-5) * gamma + beta

    xu = bnorm(xu_ref[...])
    xi = bnorm(xi_ref[...])
    xt = bnorm(xt_ref[...])
    xg = bnorm(xg_ref[...])
    # DictDropout -> identity (eval-mode forward).

    def qkv(x, w_ref, b_ref):
        # One fused [N, H] @ [H, 3H] matmul per node type (96-lane result).
        y = jnp.dot(x, w_ref[...], preferred_element_type=F32) + b_ref[...]
        return y[:, :H], y[:, H:2 * H], y[:, 2 * H:]

    q_u, k_u, v_u = qkv(xu, wu_ref, bu_ref)
    q_i, k_i, v_i = qkv(xi, wi_ref, bi_ref)
    _,   k_t, v_t = qkv(xt, wt_ref, bt_ref)
    _,   k_g, v_g = qkv(xg, wg_ref, bg_ref)

    def mh_attn(q, sources):
        """Multi-head attention; joint softmax over multiple source blocks.

        sources: list of (k, v, mask) with mask[n_dst, n_src] in {0,1}.
        Heads are a static unrolled loop on in-register values; per-head results
        are merged via a lane selector so no partial-width stores are generated.
        """
        nd = q.shape[0]
        dh = H // heads
        scale = dh ** -0.5
        lane = lax.broadcasted_iota(jnp.int32, (1, H), 1)
        out = jnp.zeros((nd, H), F32)
        for hd in range(heads):
            lo = hd * dh
            qh = q[:, lo:lo + dh]
            s_blocks = []
            for k, v, msk in sources:
                kh = k[:, lo:lo + dh]
                s = lax.dot_general(qh, kh, (((1,), (1,)), ((), ())),
                                    preferred_element_type=F32) * scale
                # additive mask bias: 0 where edge exists, -1e30 otherwise
                s_blocks.append(s + (msk - 1.0) * 1e30)
            row_max = s_blocks[0].max(axis=1, keepdims=True)
            for s in s_blocks[1:]:
                row_max = jnp.maximum(row_max, s.max(axis=1, keepdims=True))
            num = jnp.zeros((nd, H), F32)
            den = jnp.zeros((nd, 1), F32)
            for s, (k, v, msk) in zip(s_blocks, sources):
                p = jnp.exp(s - row_max) * msk   # msk guards fully-masked rows
                den = den + jnp.sum(p, axis=1, keepdims=True)
                num = num + jnp.dot(p, v, preferred_element_type=F32)
            sel = ((lane >= lo) & (lane < lo + dh)).astype(F32)
            out = out + num * sel * pl.reciprocal(jnp.maximum(den, 1e-20),
                                                  approx=True)
        return out

    # Destination 'item': joint softmax over taste / image / user sources.
    msg_i = mh_attn(q_i, [(k_t, v_t, m_ti_ref[...]),
                          (k_g, v_g, m_gi_ref[...]),
                          (k_u, v_u, m_ui_ref[...])])
    # Destination 'user': item sources.
    msg_u = mh_attn(q_u, [(k_i, v_i, m_iu_ref[...])])

    def dst_update(msg, x_res, w_ref, b_ref, alpha_ref):
        a = jnp.dot(jax.nn.gelu(msg), w_ref[...],
                    preferred_element_type=F32) + b_ref[...]
        alpha = alpha_ref[...]                       # (1,1), broadcasts
        return alpha * a + (1.0 - alpha) * x_res     # HGT gated skip connection

    out_i = dst_update(msg_i, xi, ow_i_ref, ob_i_ref, alpha_i_ref)
    out_u = dst_update(msg_u, xu, ow_u_ref, ob_u_ref, alpha_u_ref)

    # DictActivate (ReLU) — single full-width store per node type.
    ou_ref[...] = jnp.maximum(out_u, 0.0)
    oi_ref[...] = jnp.maximum(out_i, 0.0)
    # TODO(synk): taste/image have no incoming edges; pass normalized features through.
    ot_ref[...] = jnp.maximum(xt, 0.0)
    og_ref[...] = jnp.maximum(xg, 0.0)


# --------------------------------------------------------------------------
# Wrapper
# --------------------------------------------------------------------------
def _vmem_spec():
    return pl.BlockSpec(memory_space=pltpu.MemorySpace.VMEM)


def multimodal_fusion_gat(params, x_dict, edge_index_dict, *, num_heads):
    # Mirror MultiModalFusionGAT.forward: filter node / edge dicts.
    x_dict = {k: v for k, v in x_dict.items() if k in NODES}
    edge_index_dict = {k: v for k, v in edge_index_dict.items() if k in EDGES}

    xu, xi, xt, xg = (x_dict["user"], x_dict["item"],
                      x_dict["taste"], x_dict["image"])
    nu, ni, nt, ng = xu.shape[0], xi.shape[0], xt.shape[0], xg.shape[0]
    H = xu.shape[1]

    def dense_mask(edge_index, n_src, n_dst):
        # PyG edge_index convention: row0 = src, row1 = dst.
        src = edge_index[0]
        dst = edge_index[1]
        return jnp.zeros((n_dst, n_src), F32).at[dst, src].set(1.0)

    m_ti = dense_mask(edge_index_dict[("taste", "associated_with", "item")], nt, ni)
    m_gi = dense_mask(edge_index_dict[("image", "associated_with", "item")], ng, ni)
    m_ui = dense_mask(edge_index_dict[("user", "buys", "item")], nu, ni)
    m_iu = dense_mask(edge_index_dict[("item", "bought_by", "user")], ni, nu)

    kern = functools.partial(_fusion_gat_kernel, heads=num_heads)
    out_shape = (
        jax.ShapeDtypeStruct((nu, H), F32),
        jax.ShapeDtypeStruct((ni, H), F32),
        jax.ShapeDtypeStruct((nt, H), F32),
        jax.ShapeDtypeStruct((ng, H), F32),
    )
    num_inputs = 24
    out = pl.pallas_call(
        kern,
        out_shape=out_shape,
        in_specs=[_vmem_spec() for _ in range(num_inputs)],
        out_specs=tuple(_vmem_spec() for _ in range(4)),
    )(
        xu, xi, xt, xg,
        params["bn_gamma"], params["bn_beta"],
        params["qkv_w_user"], params["qkv_b_user"],
        params["qkv_w_item"], params["qkv_b_item"],
        params["qkv_w_taste"], params["qkv_b_taste"],
        params["qkv_w_image"], params["qkv_b_image"],
        params["out_w_item"], params["out_b_item"],
        params["out_w_user"], params["out_b_user"],
        params["alpha_item"], params["alpha_user"],
        m_ti, m_gi, m_ui, m_iu,
    )
    return {"user": out[0], "item": out[1], "taste": out[2], "image": out[3]}


# --------------------------------------------------------------------------
# Parameter initialization (deterministic, in-script)
# --------------------------------------------------------------------------
def init_params(key, hidden_dim):
    H = hidden_dim

    def glorot(k, shape):
        fan_in, fan_out = shape
        lim = (6.0 / (fan_in + fan_out)) ** 0.5
        return jax.random.uniform(k, shape, F32, -lim, lim)

    keys = iter(jax.random.split(key, 16))
    p = {
        "bn_gamma": jnp.ones((1, H), F32),   # BatchNorm default init
        "bn_beta": jnp.zeros((1, H), F32),
    }
    for node in NODES:
        p[f"qkv_w_{node}"] = glorot(next(keys), (H, 3 * H))
        p[f"qkv_b_{node}"] = jnp.zeros((1, 3 * H), F32)
    for node in ("item", "user"):            # destination node types
        p[f"out_w_{node}"] = glorot(next(keys), (H, H))
        p[f"out_b_{node}"] = jnp.zeros((1, H), F32)
        # HGT gated skip: alpha = sigmoid(skip), skip initialized to 1.0
        p[f"alpha_{node}"] = jnp.full((1, 1), jax.nn.sigmoid(jnp.float32(1.0)), F32)
    return p


# --------------------------------------------------------------------------
# Main
# --------------------------------------------------------------------------
if __name__ == "__main__":
    H = 32
    heads = 2
    n_user, n_item, n_taste, n_image = 6, 8, 8, 8

    root = jax.random.PRNGKey(0)
    kp, kx = jax.random.split(root)
    params = init_params(kp, H)

    k1, k2, k3, k4, k5 = jax.random.split(kx, 5)
    x_dict = {
        "user": jax.random.normal(k1, (n_user, H), F32),
        "item": jax.random.normal(k2, (n_item, H), F32),
        "taste": jax.random.normal(k3, (n_taste, H), F32),
        "image": jax.random.normal(k4, (n_image, H), F32),
        "intention": jax.random.normal(k5, (n_item, H), F32),  # filtered by forward
    }

    tidx = jnp.arange(n_taste, dtype=jnp.int32)
    gidx = jnp.arange(n_image, dtype=jnp.int32)
    buys_src = jnp.arange(12, dtype=jnp.int32) % n_user
    buys_dst = (jnp.arange(12, dtype=jnp.int32) * 3) % n_item
    edge_index_dict = {
        ("taste", "associated_with", "item"): jnp.stack([tidx, tidx % n_item]),
        ("image", "associated_with", "item"): jnp.stack([gidx, gidx % n_item]),
        ("user", "buys", "item"): jnp.stack([buys_src, buys_dst]),
        ("item", "bought_by", "user"): jnp.stack([buys_dst, buys_src]),
        # extra relation, filtered by MultiModalFusionGAT.forward
        ("intention", "associated_with", "item"): jnp.stack([gidx, gidx % n_item]),
    }

    out = multimodal_fusion_gat(params, x_dict, edge_index_dict, num_heads=heads)
    jax.block_until_ready(out)
    assert set(out.keys()) == set(NODES)
    assert all(bool(jnp.all(jnp.isfinite(v))) for v in out.values())
    print("KERNEL_OK")
</pallas_src>

<mosaic_0001>
module attributes {stable_mosaic.version = 11 : i64} {
  func.func @_fusion_gat_kernel(%arg0: memref<6x32xf32, #tpu.memory_space<vmem>>, %arg1: memref<8x32xf32, #tpu.memory_space<vmem>>, %arg2: memref<8x32xf32, #tpu.memory_space<vmem>>, %arg3: memref<8x32xf32, #tpu.memory_space<vmem>>, %arg4: memref<1x32xf32, #tpu.memory_space<vmem>>, %arg5: memref<1x32xf32, #tpu.memory_space<vmem>>, %arg6: memref<32x96xf32, #tpu.memory_space<vmem>>, %arg7: memref<1x96xf32, #tpu.memory_space<vmem>>, %arg8: memref<32x96xf32, #tpu.memory_space<vmem>>, %arg9: memref<1x96xf32, #tpu.memory_space<vmem>>, %arg10: memref<32x96xf32, #tpu.memory_space<vmem>>, %arg11: memref<1x96xf32, #tpu.memory_space<vmem>>, %arg12: memref<32x96xf32, #tpu.memory_space<vmem>>, %arg13: memref<1x96xf32, #tpu.memory_space<vmem>>, %arg14: memref<32x32xf32, #tpu.memory_space<vmem>>, %arg15: memref<1x32xf32, #tpu.memory_space<vmem>>, %arg16: memref<32x32xf32, #tpu.memory_space<vmem>>, %arg17: memref<1x32xf32, #tpu.memory_space<vmem>>, %arg18: memref<1x1xf32, #tpu.memory_space<vmem>>, %arg19: memref<1x1xf32, #tpu.memory_space<vmem>>, %arg20: memref<8x8xf32, #tpu.memory_space<vmem>>, %arg21: memref<8x8xf32, #tpu.memory_space<vmem>>, %arg22: memref<8x6xf32, #tpu.memory_space<vmem>>, %arg23: memref<6x8xf32, #tpu.memory_space<vmem>>, %arg24: memref<6x32xf32, #tpu.memory_space<vmem>>, %arg25: memref<8x32xf32, #tpu.memory_space<vmem>>, %arg26: memref<8x32xf32, #tpu.memory_space<vmem>>, %arg27: memref<8x32xf32, #tpu.memory_space<vmem>>) attributes {dimension_semantics = [], scalar_prefetch = 0 : i64, scratch_operands = 0 : i64, tpu.core_type = #tpu.core_type<tc>} {
    %c0 = arith.constant 0 : index
    %c0_0 = arith.constant 0 : index
    %0 = vector.load %arg4[%c0, %c0_0] : memref<1x32xf32, #tpu.memory_space<vmem>>, vector<1x32xf32>
    %c0_1 = arith.constant 0 : index
    %c0_2 = arith.constant 0 : index
    %1 = vector.load %arg5[%c0_1, %c0_2] : memref<1x32xf32, #tpu.memory_space<vmem>>, vector<1x32xf32>
    %c0_3 = arith.constant 0 : index
    %c0_4 = arith.constant 0 : index
    %2 = vector.load %arg0[%c0_3, %c0_4] : memref<6x32xf32, #tpu.memory_space<vmem>>, vector<6x32xf32>
    %cst = arith.constant dense<0.000000e+00> : vector<32xf32>
    %3 = vector.multi_reduction <add>, %2, %cst [0] : vector<6x32xf32> to vector<32xf32>
    %4 = vector.shape_cast %3 : vector<32xf32> to vector<1x32xf32>
    %cst_5 = arith.constant 6.000000e+00 : f32
    %5 = vector.broadcast %cst_5 : f32 to vector<1x32xf32>
    %6 = arith.divf %4, %5 : vector<1x32xf32>
    %7 = vector.broadcast %6 : vector<1x32xf32> to vector<6x32xf32>
    %8 = arith.subf %2, %7 : vector<6x32xf32>
    %9 = arith.mulf %8, %8 : vector<6x32xf32>
    %cst_6 = arith.constant dense<0.000000e+00> : vector<32xf32>
    %10 = vector.multi_reduction <add>, %9, %cst_6 [0] : vector<6x32xf32> to vector<32xf32>
    %11 = vector.shape_cast %10 : vector<32xf32> to vector<1x32xf32>
    %cst_7 = arith.constant 6.000000e+00 : f32
    %12 = vector.broadcast %cst_7 : f32 to vector<1x32xf32>
    %13 = arith.divf %11, %12 : vector<1x32xf32>
    %14 = vector.broadcast %6 : vector<1x32xf32> to vector<6x32xf32>
    %15 = arith.subf %2, %14 : vector<6x32xf32>
    %cst_8 = arith.constant 9.99999974E-6 : f32
    %16 = vector.broadcast %cst_8 : f32 to vector<1x32xf32>
    %17 = arith.addf %13, %16 : vector<1x32xf32>
    %18 = math.rsqrt %17 : vector<1x32xf32>
    %19 = vector.broadcast %18 : vector<1x32xf32> to vector<6x32xf32>
    %20 = arith.mulf %15, %19 : vector<6x32xf32>
    %21 = vector.broadcast %0 : vector<1x32xf32> to vector<6x32xf32>
    %22 = arith.mulf %20, %21 : vector<6x32xf32>
    %23 = vector.broadcast %1 : vector<1x32xf32> to vector<6x32xf32>
    %24 = arith.addf %22, %23 : vector<6x32xf32>
    %c0_9 = arith.constant 0 : index
    %c0_10 = arith.constant 0 : index
    %25 = vector.load %arg1[%c0_9, %c0_10] : memref<8x32xf32, #tpu.memory_space<vmem>>, vector<8x32xf32>
    %cst_11 = arith.constant dense<0.000000e+00> : vector<32xf32>
    %26 = vector.multi_reduction <add>, %25, %cst_11 [0] : vector<8x32xf32> to vector<32xf32>
    %27 = vector.shape_cast %26 : vector<32xf32> to vector<1x32xf32>
    %cst_12 = arith.constant 8.000000e+00 : f32
    %28 = vector.broadcast %cst_12 : f32 to vector<1x32xf32>
    %29 = arith.divf %27, %28 : vector<1x32xf32>
    %30 = vector.broadcast %29 : vector<1x32xf32> to vector<8x32xf32>
    %31 = arith.subf %25, %30 : vector<8x32xf32>
    %32 = arith.mulf %31, %31 : vector<8x32xf32>
    %cst_13 = arith.constant dense<0.000000e+00> : vector<32xf32>
    %33 = vector.multi_reduction <add>, %32, %cst_13 [0] : vector<8x32xf32> to vector<32xf32>
    %34 = vector.shape_cast %33 : vector<32xf32> to vector<1x32xf32>
    %cst_14 = arith.constant 8.000000e+00 : f32
    %35 = vector.broadcast %cst_14 : f32 to vector<1x32xf32>
    %36 = arith.divf %34, %35 : vector<1x32xf32>
    %37 = vector.broadcast %29 : vector<1x32xf32> to vector<8x32xf32>
    %38 = arith.subf %25, %37 : vector<8x32xf32>
    %cst_15 = arith.constant 9.99999974E-6 : f32
    %39 = vector.broadcast %cst_15 : f32 to vector<1x32xf32>
    %40 = arith.addf %36, %39 : vector<1x32xf32>
    %41 = math.rsqrt %40 : vector<1x32xf32>
    %42 = vector.broadcast %41 : vector<1x32xf32> to vector<8x32xf32>
    %43 = arith.mulf %38, %42 : vector<8x32xf32>
    %44 = vector.broadcast %0 : vector<1x32xf32> to vector<8x32xf32>
    %45 = arith.mulf %43, %44 : vector<8x32xf32>
    %46 = vector.broadcast %1 : vector<1x32xf32> to vector<8x32xf32>
    %47 = arith.addf %45, %46 : vector<8x32xf32>
    %c0_16 = arith.constant 0 : index
    %c0_17 = arith.constant 0 : index
    %48 = vector.load %arg2[%c0_16, %c0_17] : memref<8x32xf32, #tpu.memory_space<vmem>>, vector<8x32xf32>
    %cst_18 = arith.constant dense<0.000000e+00> : vector<32xf32>
    %49 = vector.multi_reduction <add>, %48, %cst_18 [0] : vector<8x32xf32> to vector<32xf32>
    %50 = vector.shape_cast %49 : vector<32xf32> to vector<1x32xf32>
    %cst_19 = arith.constant 8.000000e+00 : f32
    %51 = vector.broadcast %cst_19 : f32 to vector<1x32xf32>
    %52 = arith.divf %50, %51 : vector<1x32xf32>
    %53 = vector.broadcast %52 : vector<1x32xf32> to vector<8x32xf32>
    %54 = arith.subf %48, %53 : vector<8x32xf32>
    %55 = arith.mulf %54, %54 : vector<8x32xf32>
    %cst_20 = arith.constant dense<0.000000e+00> : vector<32xf32>
    %56 = vector.multi_reduction <add>, %55, %cst_20 [0] : vector<8x32xf32> to vector<32xf32>
    %57 = vector.shape_cast %56 : vector<32xf32> to vector<1x32xf32>
    %cst_21 = arith.constant 8.000000e+00 : f32
    %58 = vector.broadcast %cst_21 : f32 to vector<1x32xf32>
    %59 = arith.divf %57, %58 : vector<1x32xf32>
    %60 = vector.broadcast %52 : vector<1x32xf32> to vector<8x32xf32>
    %61 = arith.subf %48, %60 : vector<8x32xf32>
    %cst_22 = arith.constant 9.99999974E-6 : f32
    %62 = vector.broadcast %cst_22 : f32 to vector<1x32xf32>
    %63 = arith.addf %59, %62 : vector<1x32xf32>
    %64 = math.rsqrt %63 : vector<1x32xf32>
    %65 = vector.broadcast %64 : vector<1x32xf32> to vector<8x32xf32>
    %66 = arith.mulf %61, %65 : vector<8x32xf32>
    %67 = vector.broadcast %0 : vector<1x32xf32> to vector<8x32xf32>
    %68 = arith.mulf %66, %67 : vector<8x32xf32>
    %69 = vector.broadcast %1 : vector<1x32xf32> to vector<8x32xf32>
    %70 = arith.addf %68, %69 : vector<8x32xf32>
    %c0_23 = arith.constant 0 : index
    %c0_24 = arith.constant 0 : index
    %71 = vector.load %arg3[%c0_23, %c0_24] : memref<8x32xf32, #tpu.memory_space<vmem>>, vector<8x32xf32>
    %cst_25 = arith.constant dense<0.000000e+00> : vector<32xf32>
    %72 = vector.multi_reduction <add>, %71, %cst_25 [0] : vector<8x32xf32> to vector<32xf32>
    %73 = vector.shape_cast %72 : vector<32xf32> to vector<1x32xf32>
    %cst_26 = arith.constant 8.000000e+00 : f32
    %74 = vector.broadcast %cst_26 : f32 to vector<1x32xf32>
    %75 = arith.divf %73, %74 : vector<1x32xf32>
    %76 = vector.broadcast %75 : vector<1x32xf32> to vector<8x32xf32>
    %77 = arith.subf %71, %76 : vector<8x32xf32>
    %78 = arith.mulf %77, %77 : vector<8x32xf32>
    %cst_27 = arith.constant dense<0.000000e+00> : vector<32xf32>
    %79 = vector.multi_reduction <add>, %78, %cst_27 [0] : vector<8x32xf32> to vector<32xf32>
    %80 = vector.shape_cast %79 : vector<32xf32> to vector<1x32xf32>
    %cst_28 = arith.constant 8.000000e+00 : f32
    %81 = vector.broadcast %cst_28 : f32 to vector<1x32xf32>
    %82 = arith.divf %80, %81 : vector<1x32xf32>
    %83 = vector.broadcast %75 : vector<1x32xf32> to vector<8x32xf32>
    %84 = arith.subf %71, %83 : vector<8x32xf32>
    %cst_29 = arith.constant 9.99999974E-6 : f32
    %85 = vector.broadcast %cst_29 : f32 to vector<1x32xf32>
    %86 = arith.addf %82, %85 : vector<1x32xf32>
    %87 = math.rsqrt %86 : vector<1x32xf32>
    %88 = vector.broadcast %87 : vector<1x32xf32> to vector<8x32xf32>
    %89 = arith.mulf %84, %88 : vector<8x32xf32>
    %90 = vector.broadcast %0 : vector<1x32xf32> to vector<8x32xf32>
    %91 = arith.mulf %89, %90 : vector<8x32xf32>
    %92 = vector.broadcast %1 : vector<1x32xf32> to vector<8x32xf32>
    %93 = arith.addf %91, %92 : vector<8x32xf32>
    %c0_30 = arith.constant 0 : index
    %c0_31 = arith.constant 0 : index
    %94 = vector.load %arg6[%c0_30, %c0_31] : memref<32x96xf32, #tpu.memory_space<vmem>>, vector<32x96xf32>
    %cst_32 = arith.constant dense<0.000000e+00> : vector<6x96xf32>
    %95 = tpu.matmul %24, %94, %cst_32 {dimension_numbers = #tpu.dot_dimension_numbers<[1], [0], [0], [1], [0, 0, 1, 1], [], []>} : vector<6x32xf32>, vector<32x96xf32>, vector<6x96xf32> -> vector<6x96xf32>
    %c0_33 = arith.constant 0 : index
    %c0_34 = arith.constant 0 : index
    %96 = vector.load %arg7[%c0_33, %c0_34] : memref<1x96xf32, #tpu.memory_space<vmem>>, vector<1x96xf32>
    %97 = vector.broadcast %96 : vector<1x96xf32> to vector<6x96xf32>
    %98 = arith.addf %95, %97 : vector<6x96xf32>
    %99 = vector.extract_strided_slice %98 {offsets = [0, 0], sizes = [6, 32], strides = [1, 1]} : vector<6x96xf32> to vector<6x32xf32>
    %100 = vector.extract_strided_slice %98 {offsets = [0, 32], sizes = [6, 32], strides = [1, 1]} : vector<6x96xf32> to vector<6x32xf32>
    %101 = vector.extract_strided_slice %98 {offsets = [0, 64], sizes = [6, 32], strides = [1, 1]} : vector<6x96xf32> to vector<6x32xf32>
    %c0_35 = arith.constant 0 : index
    %c0_36 = arith.constant 0 : index
    %102 = vector.load %arg8[%c0_35, %c0_36] : memref<32x96xf32, #tpu.memory_space<vmem>>, vector<32x96xf32>
    %cst_37 = arith.constant dense<0.000000e+00> : vector<8x96xf32>
    %103 = tpu.matmul %47, %102, %cst_37 {dimension_numbers = #tpu.dot_dimension_numbers<[1], [0], [0], [1], [0, 0, 1, 1], [], []>} : vector<8x32xf32>, vector<32x96xf32>, vector<8x96xf32> -> vector<8x96xf32>
    %c0_38 = arith.constant 0 : index
    %c0_39 = arith.constant 0 : index
    %104 = vector.load %arg9[%c0_38, %c0_39] : memref<1x96xf32, #tpu.memory_space<vmem>>, vector<1x96xf32>
    %105 = vector.broadcast %104 : vector<1x96xf32> to vector<8x96xf32>
    %106 = arith.addf %103, %105 : vector<8x96xf32>
    %107 = vector.extract_strided_slice %106 {offsets = [0, 0], sizes = [8, 32], strides = [1, 1]} : vector<8x96xf32> to vector<8x32xf32>
    %108 = vector.extract_strided_slice %106 {offsets = [0, 32], sizes = [8, 32], strides = [1, 1]} : vector<8x96xf32> to vector<8x32xf32>
    %109 = vector.extract_strided_slice %106 {offsets = [0, 64], sizes = [8, 32], strides = [1, 1]} : vector<8x96xf32> to vector<8x32xf32>
    %c0_40 = arith.constant 0 : index
    %c0_41 = arith.constant 0 : index
    %110 = vector.load %arg10[%c0_40, %c0_41] : memref<32x96xf32, #tpu.memory_space<vmem>>, vector<32x96xf32>
    %cst_42 = arith.constant dense<0.000000e+00> : vector<8x96xf32>
    %111 = tpu.matmul %70, %110, %cst_42 {dimension_numbers = #tpu.dot_dimension_numbers<[1], [0], [0], [1], [0, 0, 1, 1], [], []>} : vector<8x32xf32>, vector<32x96xf32>, vector<8x96xf32> -> vector<8x96xf32>
    %c0_43 = arith.constant 0 : index
    %c0_44 = arith.constant 0 : index
    %112 = vector.load %arg11[%c0_43, %c0_44] : memref<1x96xf32, #tpu.memory_space<vmem>>, vector<1x96xf32>
    %113 = vector.broadcast %112 : vector<1x96xf32> to vector<8x96xf32>
    %114 = arith.addf %111, %113 : vector<8x96xf32>
    %115 = vector.extract_strided_slice %114 {offsets = [0, 32], sizes = [8, 32], strides = [1, 1]} : vector<8x96xf32> to vector<8x32xf32>
    %116 = vector.extract_strided_slice %114 {offsets = [0, 64], sizes = [8, 32], strides = [1, 1]} : vector<8x96xf32> to vector<8x32xf32>
    %c0_45 = arith.constant 0 : index
    %c0_46 = arith.constant 0 : index
    %117 = vector.load %arg12[%c0_45, %c0_46] : memref<32x96xf32, #tpu.memory_space<vmem>>, vector<32x96xf32>
    %cst_47 = arith.constant dense<0.000000e+00> : vector<8x96xf32>
    %118 = tpu.matmul %93, %117, %cst_47 {dimension_numbers = #tpu.dot_dimension_numbers<[1], [0], [0], [1], [0, 0, 1, 1], [], []>} : vector<8x32xf32>, vector<32x96xf32>, vector<8x96xf32> -> vector<8x96xf32>
    %c0_48 = arith.constant 0 : index
    %c0_49 = arith.constant 0 : index
    %119 = vector.load %arg13[%c0_48, %c0_49] : memref<1x96xf32, #tpu.memory_space<vmem>>, vector<1x96xf32>
    %120 = vector.broadcast %119 : vector<1x96xf32> to vector<8x96xf32>
    %121 = arith.addf %118, %120 : vector<8x96xf32>
    %122 = vector.extract_strided_slice %121 {offsets = [0, 32], sizes = [8, 32], strides = [1, 1]} : vector<8x96xf32> to vector<8x32xf32>
    %123 = vector.extract_strided_slice %121 {offsets = [0, 64], sizes = [8, 32], strides = [1, 1]} : vector<8x96xf32> to vector<8x32xf32>
    %c0_50 = arith.constant 0 : index
    %c0_51 = arith.constant 0 : index
    %124 = vector.load %arg20[%c0_50, %c0_51] : memref<8x8xf32, #tpu.memory_space<vmem>>, vector<8x8xf32>
    %c0_52 = arith.constant 0 : index
    %c0_53 = arith.constant 0 : index
    %125 = vector.load %arg21[%c0_52, %c0_53] : memref<8x8xf32, #tpu.memory_space<vmem>>, vector<8x8xf32>
    %c0_54 = arith.constant 0 : index
    %c0_55 = arith.constant 0 : index
    %126 = vector.load %arg22[%c0_54, %c0_55] : memref<8x6xf32, #tpu.memory_space<vmem>>, vector<8x6xf32>
    %127 = tpu.iota {dimensions = array<i32: 1>} : vector<1x32xi32>
    %cst_56 = arith.constant 0.000000e+00 : f32
    %128 = vector.broadcast %cst_56 : f32 to vector<8x32xf32>
    %129 = vector.extract_strided_slice %107 {offsets = [0, 0], sizes = [8, 16], strides = [1, 1]} : vector<8x32xf32> to vector<8x16xf32>
    %130 = vector.extract_strided_slice %115 {offsets = [0, 0], sizes = [8, 16], strides = [1, 1]} : vector<8x32xf32> to vector<8x16xf32>
    %cst_57 = arith.constant dense<0.000000e+00> : vector<8x8xf32>
    %131 = tpu.matmul %129, %130, %cst_57 {dimension_numbers = #tpu.dot_dimension_numbers<[1], [1], [0], [0], [0, 0, 1, 0], [], []>} : vector<8x16xf32>, vector<8x16xf32>, vector<8x8xf32> -> vector<8x8xf32>
    %cst_58 = arith.constant 2.500000e-01 : f32
    %132 = vector.broadcast %cst_58 : f32 to vector<8x8xf32>
    %133 = arith.mulf %131, %132 : vector<8x8xf32>
    %cst_59 = arith.constant 1.000000e+00 : f32
    %134 = vector.broadcast %cst_59 : f32 to vector<8x8xf32>
    %135 = arith.subf %124, %134 : vector<8x8xf32>
    %cst_60 = arith.constant 1.000000e+30 : f32
    %136 = vector.broadcast %cst_60 : f32 to vector<8x8xf32>
    %137 = arith.mulf %135, %136 : vector<8x8xf32>
    %138 = arith.addf %133, %137 : vector<8x8xf32>
    %139 = vector.extract_strided_slice %122 {offsets = [0, 0], sizes = [8, 16], strides = [1, 1]} : vector<8x32xf32> to vector<8x16xf32>
    %cst_61 = arith.constant dense<0.000000e+00> : vector<8x8xf32>
    %140 = tpu.matmul %129, %139, %cst_61 {dimension_numbers = #tpu.dot_dimension_numbers<[1], [1], [0], [0], [0, 0, 1, 0], [], []>} : vector<8x16xf32>, vector<8x16xf32>, vector<8x8xf32> -> vector<8x8xf32>
    %cst_62 = arith.constant 2.500000e-01 : f32
    %141 = vector.broadcast %cst_62 : f32 to vector<8x8xf32>
    %142 = arith.mulf %140, %141 : vector<8x8xf32>
    %cst_63 = arith.constant 1.000000e+00 : f32
    %143 = vector.broadcast %cst_63 : f32 to vector<8x8xf32>
    %144 = arith.subf %125, %143 : vector<8x8xf32>
    %cst_64 = arith.constant 1.000000e+30 : f32
    %145 = vector.broadcast %cst_64 : f32 to vector<8x8xf32>
    %146 = arith.mulf %144, %145 : vector<8x8xf32>
    %147 = arith.addf %142, %146 : vector<8x8xf32>
    %148 = vector.extract_strided_slice %100 {offsets = [0, 0], sizes = [6, 16], strides = [1, 1]} : vector<6x32xf32> to vector<6x16xf32>
    %cst_65 = arith.constant dense<0.000000e+00> : vector<8x6xf32>
    %149 = tpu.matmul %129, %148, %cst_65 {dimension_numbers = #tpu.dot_dimension_numbers<[1], [1], [0], [0], [0, 0, 1, 0], [], []>} : vector<8x16xf32>, vector<6x16xf32>, vector<8x6xf32> -> vector<8x6xf32>
    %cst_66 = arith.constant 2.500000e-01 : f32
    %150 = vector.broadcast %cst_66 : f32 to vector<8x6xf32>
    %151 = arith.mulf %149, %150 : vector<8x6xf32>
    %cst_67 = arith.constant 1.000000e+00 : f32
    %152 = vector.broadcast %cst_67 : f32 to vector<8x6xf32>
    %153 = arith.subf %126, %152 : vector<8x6xf32>
    %cst_68 = arith.constant 1.000000e+30 : f32
    %154 = vector.broadcast %cst_68 : f32 to vector<8x6xf32>
    %155 = arith.mulf %153, %154 : vector<8x6xf32>
    %156 = arith.addf %151, %155 : vector<8x6xf32>
    %cst_69 = arith.constant dense<0xFF800000> : vector<8xf32>
    %157 = vector.multi_reduction <maximumf>, %138, %cst_69 [1] : vector<8x8xf32> to vector<8xf32>
    %158 = vector.shape_cast %157 : vector<8xf32> to vector<8x1xf32>
    %cst_70 = arith.constant dense<0xFF800000> : vector<8xf32>
    %159 = vector.multi_reduction <maximumf>, %147, %cst_70 [1] : vector<8x8xf32> to vector<8xf32>
    %160 = vector.shape_cast %159 : vector<8xf32> to vector<8x1xf32>
    %161 = arith.maximumf %158, %160 : vector<8x1xf32>
    %cst_71 = arith.constant dense<0xFF800000> : vector<8xf32>
    %162 = vector.multi_reduction <maximumf>, %156, %cst_71 [1] : vector<8x6xf32> to vector<8xf32>
    %163 = vector.shape_cast %162 : vector<8xf32> to vector<8x1xf32>
    %164 = arith.maximumf %161, %163 : vector<8x1xf32>
    %cst_72 = arith.constant 0.000000e+00 : f32
    %165 = vector.broadcast %cst_72 : f32 to vector<8x32xf32>
    %cst_73 = arith.constant 0.000000e+00 : f32
    %166 = vector.broadcast %cst_73 : f32 to vector<8x1xf32>
    %167 = vector.broadcast %164 : vector<8x1xf32> to vector<8x8xf32>
    %168 = arith.subf %138, %167 : vector<8x8xf32>
    %169 = math.exp %168 : vector<8x8xf32>
    %170 = arith.mulf %169, %124 : vector<8x8xf32>
    %cst_74 = arith.constant dense<0.000000e+00> : vector<8xf32>
    %171 = vector.multi_reduction <add>, %170, %cst_74 [1] : vector<8x8xf32> to vector<8xf32>
    %172 = vector.shape_cast %171 : vector<8xf32> to vector<8x1xf32>
    %173 = arith.addf %166, %172 : vector<8x1xf32>
    %cst_75 = arith.constant dense<0.000000e+00> : vector<8x32xf32>
    %174 = tpu.matmul %170, %116, %cst_75 {dimension_numbers = #tpu.dot_dimension_numbers<[1], [0], [0], [1], [0, 0, 1, 1], [], []>} : vector<8x8xf32>, vector<8x32xf32>, vector<8x32xf32> -> vector<8x32xf32>
    %175 = arith.addf %165, %174 : vector<8x32xf32>
    %176 = vector.broadcast %164 : vector<8x1xf32> to vector<8x8xf32>
    %177 = arith.subf %147, %176 : vector<8x8xf32>
    %178 = math.exp %177 : vector<8x8xf32>
    %179 = arith.mulf %178, %125 : vector<8x8xf32>
    %cst_76 = arith.constant dense<0.000000e+00> : vector<8xf32>
    %180 = vector.multi_reduction <add>, %179, %cst_76 [1] : vector<8x8xf32> to vector<8xf32>
    %181 = vector.shape_cast %180 : vector<8xf32> to vector<8x1xf32>
    %182 = arith.addf %173, %181 : vector<8x1xf32>
    %cst_77 = arith.constant dense<0.000000e+00> : vector<8x32xf32>
    %183 = tpu.matmul %179, %123, %cst_77 {dimension_numbers = #tpu.dot_dimension_numbers<[1], [0], [0], [1], [0, 0, 1, 1], [], []>} : vector<8x8xf32>, vector<8x32xf32>, vector<8x32xf32> -> vector<8x32xf32>
    %184 = arith.addf %175, %183 : vector<8x32xf32>
    %185 = vector.broadcast %164 : vector<8x1xf32> to vector<8x6xf32>
    %186 = arith.subf %156, %185 : vector<8x6xf32>
    %187 = math.exp %186 : vector<8x6xf32>
    %188 = arith.mulf %187, %126 : vector<8x6xf32>
    %cst_78 = arith.constant dense<0.000000e+00> : vector<8xf32>
    %189 = vector.multi_reduction <add>, %188, %cst_78 [1] : vector<8x6xf32> to vector<8xf32>
    %190 = vector.shape_cast %189 : vector<8xf32> to vector<8x1xf32>
    %191 = arith.addf %182, %190 : vector<8x1xf32>
    %cst_79 = arith.constant dense<0.000000e+00> : vector<8x32xf32>
    %192 = tpu.matmul %188, %101, %cst_79 {dimension_numbers = #tpu.dot_dimension_numbers<[1], [0], [0], [1], [0, 0, 1, 1], [], []>} : vector<8x6xf32>, vector<6x32xf32>, vector<8x32xf32> -> vector<8x32xf32>
    %193 = arith.addf %184, %192 : vector<8x32xf32>
    %c0_i32 = arith.constant 0 : i32
    %194 = vector.broadcast %c0_i32 : i32 to vector<1x32xi32>
    %195 = arith.cmpi sge, %127, %194 : vector<1x32xi32>
    %c16_i32 = arith.constant 16 : i32
    %196 = vector.broadcast %c16_i32 : i32 to vector<1x32xi32>
    %197 = arith.cmpi slt, %127, %196 : vector<1x32xi32>
    %198 = arith.andi %195, %197 : vector<1x32xi1>
    %199 = arith.extui %198 : vector<1x32xi1> to vector<1x32xi32>
    %200 = arith.sitofp %199 : vector<1x32xi32> to vector<1x32xf32>
    %201 = vector.broadcast %200 : vector<1x32xf32> to vector<8x32xf32>
    %202 = arith.mulf %193, %201 : vector<8x32xf32>
    %cst_80 = arith.constant 9.99999968E-21 : f32
    %203 = vector.broadcast %cst_80 : f32 to vector<8x1xf32>
    %204 = arith.maximumf %191, %203 : vector<8x1xf32>
    %205 = tpu.reciprocal %204 {approx = true} : vector<8x1xf32> -> vector<8x1xf32>
    %206 = vector.broadcast %205 : vector<8x1xf32> to vector<8x32xf32>
    %207 = arith.mulf %202, %206 : vector<8x32xf32>
    %208 = arith.addf %128, %207 : vector<8x32xf32>
    %209 = vector.extract_strided_slice %107 {offsets = [0, 16], sizes = [8, 16], strides = [1, 1]} : vector<8x32xf32> to vector<8x16xf32>
    %210 = vector.extract_strided_slice %115 {offsets = [0, 16], sizes = [8, 16], strides = [1, 1]} : vector<8x32xf32> to vector<8x16xf32>
    %cst_81 = arith.constant dense<0.000000e+00> : vector<8x8xf32>
    %211 = tpu.matmul %209, %210, %cst_81 {dimension_numbers = #tpu.dot_dimension_numbers<[1], [1], [0], [0], [0, 0, 1, 0], [], []>} : vector<8x16xf32>, vector<8x16xf32>, vector<8x8xf32> -> vector<8x8xf32>
    %cst_82 = arith.constant 2.500000e-01 : f32
    %212 = vector.broadcast %cst_82 : f32 to vector<8x8xf32>
    %213 = arith.mulf %211, %212 : vector<8x8xf32>
    %cst_83 = arith.constant 1.000000e+00 : f32
    %214 = vector.broadcast %cst_83 : f32 to vector<8x8xf32>
    %215 = arith.subf %124, %214 : vector<8x8xf32>
    %cst_84 = arith.constant 1.000000e+30 : f32
    %216 = vector.broadcast %cst_84 : f32 to vector<8x8xf32>
    %217 = arith.mulf %215, %216 : vector<8x8xf32>
    %218 = arith.addf %213, %217 : vector<8x8xf32>
    %219 = vector.extract_strided_slice %122 {offsets = [0, 16], sizes = [8, 16], strides = [1, 1]} : vector<8x32xf32> to vector<8x16xf32>
    %cst_85 = arith.constant dense<0.000000e+00> : vector<8x8xf32>
    %220 = tpu.matmul %209, %219, %cst_85 {dimension_numbers = #tpu.dot_dimension_numbers<[1], [1], [0], [0], [0, 0, 1, 0], [], []>} : vector<8x16xf32>, vector<8x16xf32>, vector<8x8xf32> -> vector<8x8xf32>
    %cst_86 = arith.constant 2.500000e-01 : f32
    %221 = vector.broadcast %cst_86 : f32 to vector<8x8xf32>
    %222 = arith.mulf %220, %221 : vector<8x8xf32>
    %cst_87 = arith.constant 1.000000e+00 : f32
    %223 = vector.broadcast %cst_87 : f32 to vector<8x8xf32>
    %224 = arith.subf %125, %223 : vector<8x8xf32>
    %cst_88 = arith.constant 1.000000e+30 : f32
    %225 = vector.broadcast %cst_88 : f32 to vector<8x8xf32>
    %226 = arith.mulf %224, %225 : vector<8x8xf32>
    %227 = arith.addf %222, %226 : vector<8x8xf32>
    %228 = vector.extract_strided_slice %100 {offsets = [0, 16], sizes = [6, 16], strides = [1, 1]} : vector<6x32xf32> to vector<6x16xf32>
    %cst_89 = arith.constant dense<0.000000e+00> : vector<8x6xf32>
    %229 = tpu.matmul %209, %228, %cst_89 {dimension_numbers = #tpu.dot_dimension_numbers<[1], [1], [0], [0], [0, 0, 1, 0], [], []>} : vector<8x16xf32>, vector<6x16xf32>, vector<8x6xf32> -> vector<8x6xf32>
    %cst_90 = arith.constant 2.500000e-01 : f32
    %230 = vector.broadcast %cst_90 : f32 to vector<8x6xf32>
    %231 = arith.mulf %229, %230 : vector<8x6xf32>
    %cst_91 = arith.constant 1.000000e+00 : f32
    %232 = vector.broadcast %cst_91 : f32 to vector<8x6xf32>
    %233 = arith.subf %126, %232 : vector<8x6xf32>
    %cst_92 = arith.constant 1.000000e+30 : f32
    %234 = vector.broadcast %cst_92 : f32 to vector<8x6xf32>
    %235 = arith.mulf %233, %234 : vector<8x6xf32>
    %236 = arith.addf %231, %235 : vector<8x6xf32>
    %cst_93 = arith.constant dense<0xFF800000> : vector<8xf32>
    %237 = vector.multi_reduction <maximumf>, %218, %cst_93 [1] : vector<8x8xf32> to vector<8xf32>
    %238 = vector.shape_cast %237 : vector<8xf32> to vector<8x1xf32>
    %cst_94 = arith.constant dense<0xFF800000> : vector<8xf32>
    %239 = vector.multi_reduction <maximumf>, %227, %cst_94 [1] : vector<8x8xf32> to vector<8xf32>
    %240 = vector.shape_cast %239 : vector<8xf32> to vector<8x1xf32>
    %241 = arith.maximumf %238, %240 : vector<8x1xf32>
    %cst_95 = arith.constant dense<0xFF800000> : vector<8xf32>
    %242 = vector.multi_reduction <maximumf>, %236, %cst_95 [1] : vector<8x6xf32> to vector<8xf32>
    %243 = vector.shape_cast %242 : vector<8xf32> to vector<8x1xf32>
    %244 = arith.maximumf %241, %243 : vector<8x1xf32>
    %cst_96 = arith.constant 0.000000e+00 : f32
    %245 = vector.broadcast %cst_96 : f32 to vector<8x32xf32>
    %cst_97 = arith.constant 0.000000e+00 : f32
    %246 = vector.broadcast %cst_97 : f32 to vector<8x1xf32>
    %247 = vector.broadcast %244 : vector<8x1xf32> to vector<8x8xf32>
    %248 = arith.subf %218, %247 : vector<8x8xf32>
    %249 = math.exp %248 : vector<8x8xf32>
    %250 = arith.mulf %249, %124 : vector<8x8xf32>
    %cst_98 = arith.constant dense<0.000000e+00> : vector<8xf32>
    %251 = vector.multi_reduction <add>, %250, %cst_98 [1] : vector<8x8xf32> to vector<8xf32>
    %252 = vector.shape_cast %251 : vector<8xf32> to vector<8x1xf32>
    %253 = arith.addf %246, %252 : vector<8x1xf32>
    %cst_99 = arith.constant dense<0.000000e+00> : vector<8x32xf32>
    %254 = tpu.matmul %250, %116, %cst_99 {dimension_numbers = #tpu.dot_dimension_numbers<[1], [0], [0], [1], [0, 0, 1, 1], [], []>} : vector<8x8xf32>, vector<8x32xf32>, vector<8x32xf32> -> vector<8x32xf32>
    %255 = arith.addf %245, %254 : vector<8x32xf32>
    %256 = vector.broadcast %244 : vector<8x1xf32> to vector<8x8xf32>
    %257 = arith.subf %227, %256 : vector<8x8xf32>
    %258 = math.exp %257 : vector<8x8xf32>
    %259 = arith.mulf %258, %125 : vector<8x8xf32>
    %cst_100 = arith.constant dense<0.000000e+00> : vector<8xf32>
    %260 = vector.multi_reduction <add>, %259, %cst_100 [1] : vector<8x8xf32> to vector<8xf32>
    %261 = vector.shape_cast %260 : vector<8xf32> to vector<8x1xf32>
    %262 = arith.addf %253, %261 : vector<8x1xf32>
    %cst_101 = arith.constant dense<0.000000e+00> : vector<8x32xf32>
    %263 = tpu.matmul %259, %123, %cst_101 {dimension_numbers = #tpu.dot_dimension_numbers<[1], [0], [0], [1], [0, 0, 1, 1], [], []>} : vector<8x8xf32>, vector<8x32xf32>, vector<8x32xf32> -> vector<8x32xf32>
    %264 = arith.addf %255, %263 : vector<8x32xf32>
    %265 = vector.broadcast %244 : vector<8x1xf32> to vector<8x6xf32>
    %266 = arith.subf %236, %265 : vector<8x6xf32>
    %267 = math.exp %266 : vector<8x6xf32>
    %268 = arith.mulf %267, %126 : vector<8x6xf32>
    %cst_102 = arith.constant dense<0.000000e+00> : vector<8xf32>
    %269 = vector.multi_reduction <add>, %268, %cst_102 [1] : vector<8x6xf32> to vector<8xf32>
    %270 = vector.shape_cast %269 : vector<8xf32> to vector<8x1xf32>
    %271 = arith.addf %262, %270 : vector<8x1xf32>
    %cst_103 = arith.constant dense<0.000000e+00> : vector<8x32xf32>
    %272 = tpu.matmul %268, %101, %cst_103 {dimension_numbers = #tpu.dot_dimension_numbers<[1], [0], [0], [1], [0, 0, 1, 1], [], []>} : vector<8x6xf32>, vector<6x32xf32>, vector<8x32xf32> -> vector<8x32xf32>
    %273 = arith.addf %264, %272 : vector<8x32xf32>
    %c16_i32_104 = arith.constant 16 : i32
    %274 = vector.broadcast %c16_i32_104 : i32 to vector<1x32xi32>
    %275 = arith.cmpi sge, %127, %274 : vector<1x32xi32>
    %c32_i32 = arith.constant 32 : i32
    %276 = vector.broadcast %c32_i32 : i32 to vector<1x32xi32>
    %277 = arith.cmpi slt, %127, %276 : vector<1x32xi32>
    %278 = arith.andi %275, %277 : vector<1x32xi1>
    %279 = arith.extui %278 : vector<1x32xi1> to vector<1x32xi32>
    %280 = arith.sitofp %279 : vector<1x32xi32> to vector<1x32xf32>
    %281 = vector.broadcast %280 : vector<1x32xf32> to vector<8x32xf32>
    %282 = arith.mulf %273, %281 : vector<8x32xf32>
    %cst_105 = arith.constant 9.99999968E-21 : f32
    %283 = vector.broadcast %cst_105 : f32 to vector<8x1xf32>
    %284 = arith.maximumf %271, %283 : vector<8x1xf32>
    %285 = tpu.reciprocal %284 {approx = true} : vector<8x1xf32> -> vector<8x1xf32>
    %286 = vector.broadcast %285 : vector<8x1xf32> to vector<8x32xf32>
    %287 = arith.mulf %282, %286 : vector<8x32xf32>
    %288 = arith.addf %208, %287 : vector<8x32xf32>
    %c0_106 = arith.constant 0 : index
    %c0_107 = arith.constant 0 : index
    %289 = vector.load %arg23[%c0_106, %c0_107] : memref<6x8xf32, #tpu.memory_space<vmem>>, vector<6x8xf32>
    %290 = tpu.iota {dimensions = array<i32: 1>} : vector<1x32xi32>
    %cst_108 = arith.constant 0.000000e+00 : f32
    %291 = vector.broadcast %cst_108 : f32 to vector<6x32xf32>
    %292 = vector.extract_strided_slice %99 {offsets = [0, 0], sizes = [6, 16], strides = [1, 1]} : vector<6x32xf32> to vector<6x16xf32>
    %293 = vector.extract_strided_slice %108 {offsets = [0, 0], sizes = [8, 16], strides = [1, 1]} : vector<8x32xf32> to vector<8x16xf32>
    %cst_109 = arith.constant dense<0.000000e+00> : vector<6x8xf32>
    %294 = tpu.matmul %292, %293, %cst_109 {dimension_numbers = #tpu.dot_dimension_numbers<[1], [1], [0], [0], [0, 0, 1, 0], [], []>} : vector<6x16xf32>, vector<8x16xf32>, vector<6x8xf32> -> vector<6x8xf32>
    %cst_110 = arith.constant 2.500000e-01 : f32
    %295 = vector.broadcast %cst_110 : f32 to vector<6x8xf32>
    %296 = arith.mulf %294, %295 : vector<6x8xf32>
    %cst_111 = arith.constant 1.000000e+00 : f32
    %297 = vector.broadcast %cst_111 : f32 to vector<6x8xf32>
    %298 = arith.subf %289, %297 : vector<6x8xf32>
    %cst_112 = arith.constant 1.000000e+30 : f32
    %299 = vector.broadcast %cst_112 : f32 to vector<6x8xf32>
    %300 = arith.mulf %298, %299 : vector<6x8xf32>
    %301 = arith.addf %296, %300 : vector<6x8xf32>
    %cst_113 = arith.constant dense<0xFF800000> : vector<6xf32>
    %302 = vector.multi_reduction <maximumf>, %301, %cst_113 [1] : vector<6x8xf32> to vector<6xf32>
    %303 = vector.shape_cast %302 : vector<6xf32> to vector<6x1xf32>
    %cst_114 = arith.constant 0.000000e+00 : f32
    %304 = vector.broadcast %cst_114 : f32 to vector<6x32xf32>
    %cst_115 = arith.constant 0.000000e+00 : f32
    %305 = vector.broadcast %cst_115 : f32 to vector<6x1xf32>
    %306 = vector.broadcast %303 : vector<6x1xf32> to vector<6x8xf32>
    %307 = arith.subf %301, %306 : vector<6x8xf32>
    %308 = math.exp %307 : vector<6x8xf32>
    %309 = arith.mulf %308, %289 : vector<6x8xf32>
    %cst_116 = arith.constant dense<0.000000e+00> : vector<6xf32>
    %310 = vector.multi_reduction <add>, %309, %cst_116 [1] : vector<6x8xf32> to vector<6xf32>
    %311 = vector.shape_cast %310 : vector<6xf32> to vector<6x1xf32>
    %312 = arith.addf %305, %311 : vector<6x1xf32>
    %cst_117 = arith.constant dense<0.000000e+00> : vector<6x32xf32>
    %313 = tpu.matmul %309, %109, %cst_117 {dimension_numbers = #tpu.dot_dimension_numbers<[1], [0], [0], [1], [0, 0, 1, 1], [], []>} : vector<6x8xf32>, vector<8x32xf32>, vector<6x32xf32> -> vector<6x32xf32>
    %314 = arith.addf %304, %313 : vector<6x32xf32>
    %c0_i32_118 = arith.constant 0 : i32
    %315 = vector.broadcast %c0_i32_118 : i32 to vector<1x32xi32>
    %316 = arith.cmpi sge, %290, %315 : vector<1x32xi32>
    %c16_i32_119 = arith.constant 16 : i32
    %317 = vector.broadcast %c16_i32_119 : i32 to vector<1x32xi32>
    %318 = arith.cmpi slt, %290, %317 : vector<1x32xi32>
    %319 = arith.andi %316, %318 : vector<1x32xi1>
    %320 = arith.extui %319 : vector<1x32xi1> to vector<1x32xi32>
    %321 = arith.sitofp %320 : vector<1x32xi32> to vector<1x32xf32>
    %322 = vector.broadcast %321 : vector<1x32xf32> to vector<6x32xf32>
    %323 = arith.mulf %314, %322 : vector<6x32xf32>
    %cst_120 = arith.constant 9.99999968E-21 : f32
    %324 = vector.broadcast %cst_120 : f32 to vector<6x1xf32>
    %325 = arith.maximumf %312, %324 : vector<6x1xf32>
    %326 = tpu.reciprocal %325 {approx = true} : vector<6x1xf32> -> vector<6x1xf32>
    %327 = vector.broadcast %326 : vector<6x1xf32> to vector<6x32xf32>
    %328 = arith.mulf %323, %327 : vector<6x32xf32>
    %329 = arith.addf %291, %328 : vector<6x32xf32>
    %330 = vector.extract_strided_slice %99 {offsets = [0, 16], sizes = [6, 16], strides = [1, 1]} : vector<6x32xf32> to vector<6x16xf32>
    %331 = vector.extract_strided_slice %108 {offsets = [0, 16], sizes = [8, 16], strides = [1, 1]} : vector<8x32xf32> to vector<8x16xf32>
    %cst_121 = arith.constant dense<0.000000e+00> : vector<6x8xf32>
    %332 = tpu.matmul %330, %331, %cst_121 {dimension_numbers = #tpu.dot_dimension_numbers<[1], [1], [0], [0], [0, 0, 1, 0], [], []>} : vector<6x16xf32>, vector<8x16xf32>, vector<6x8xf32> -> vector<6x8xf32>
    %cst_122 = arith.constant 2.500000e-01 : f32
    %333 = vector.broadcast %cst_122 : f32 to vector<6x8xf32>
    %334 = arith.mulf %332, %333 : vector<6x8xf32>
    %cst_123 = arith.constant 1.000000e+00 : f32
    %335 = vector.broadcast %cst_123 : f32 to vector<6x8xf32>
    %336 = arith.subf %289, %335 : vector<6x8xf32>
    %cst_124 = arith.constant 1.000000e+30 : f32
    %337 = vector.broadcast %cst_124 : f32 to vector<6x8xf32>
    %338 = arith.mulf %336, %337 : vector<6x8xf32>
    %339 = arith.addf %334, %338 : vector<6x8xf32>
    %cst_125 = arith.constant dense<0xFF800000> : vector<6xf32>
    %340 = vector.multi_reduction <maximumf>, %339, %cst_125 [1] : vector<6x8xf32> to vector<6xf32>
    %341 = vector.shape_cast %340 : vector<6xf32> to vector<6x1xf32>
    %cst_126 = arith.constant 0.000000e+00 : f32
    %342 = vector.broadcast %cst_126 : f32 to vector<6x32xf32>
    %cst_127 = arith.constant 0.000000e+00 : f32
    %343 = vector.broadcast %cst_127 : f32 to vector<6x1xf32>
    %344 = vector.broadcast %341 : vector<6x1xf32> to vector<6x8xf32>
    %345 = arith.subf %339, %344 : vector<6x8xf32>
    %346 = math.exp %345 : vector<6x8xf32>
    %347 = arith.mulf %346, %289 : vector<6x8xf32>
    %cst_128 = arith.constant dense<0.000000e+00> : vector<6xf32>
    %348 = vector.multi_reduction <add>, %347, %cst_128 [1] : vector<6x8xf32> to vector<6xf32>
    %349 = vector.shape_cast %348 : vector<6xf32> to vector<6x1xf32>
    %350 = arith.addf %343, %349 : vector<6x1xf32>
    %cst_129 = arith.constant dense<0.000000e+00> : vector<6x32xf32>
    %351 = tpu.matmul %347, %109, %cst_129 {dimension_numbers = #tpu.dot_dimension_numbers<[1], [0], [0], [1], [0, 0, 1, 1], [], []>} : vector<6x8xf32>, vector<8x32xf32>, vector<6x32xf32> -> vector<6x32xf32>
    %352 = arith.addf %342, %351 : vector<6x32xf32>
    %c16_i32_130 = arith.constant 16 : i32
    %353 = vector.broadcast %c16_i32_130 : i32 to vector<1x32xi32>
    %354 = arith.cmpi sge, %290, %353 : vector<1x32xi32>
    %c32_i32_131 = arith.constant 32 : i32
    %355 = vector.broadcast %c32_i32_131 : i32 to vector<1x32xi32>
    %356 = arith.cmpi slt, %290, %355 : vector<1x32xi32>
    %357 = arith.andi %354, %356 : vector<1x32xi1>
    %358 = arith.extui %357 : vector<1x32xi1> to vector<1x32xi32>
    %359 = arith.sitofp %358 : vector<1x32xi32> to vector<1x32xf32>
    %360 = vector.broadcast %359 : vector<1x32xf32> to vector<6x32xf32>
    %361 = arith.mulf %352, %360 : vector<6x32xf32>
    %cst_132 = arith.constant 9.99999968E-21 : f32
    %362 = vector.broadcast %cst_132 : f32 to vector<6x1xf32>
    %363 = arith.maximumf %350, %362 : vector<6x1xf32>
    %364 = tpu.reciprocal %363 {approx = true} : vector<6x1xf32> -> vector<6x1xf32>
    %365 = vector.broadcast %364 : vector<6x1xf32> to vector<6x32xf32>
    %366 = arith.mulf %361, %365 : vector<6x32xf32>
    %367 = arith.addf %329, %366 : vector<6x32xf32>
    %368 = arith.mulf %288, %288 : vector<8x32xf32>
    %369 = arith.mulf %288, %368 : vector<8x32xf32>
    %cst_133 = arith.constant 4.471500e-02 : f32
    %370 = vector.broadcast %cst_133 : f32 to vector<8x32xf32>
    %371 = arith.mulf %370, %369 : vector<8x32xf32>
    %372 = arith.addf %288, %371 : vector<8x32xf32>
    %cst_134 = arith.constant 0.797884583 : f32
    %373 = vector.broadcast %cst_134 : f32 to vector<8x32xf32>
    %374 = arith.mulf %373, %372 : vector<8x32xf32>
    %375 = math.tanh %374 : vector<8x32xf32>
    %cst_135 = arith.constant 1.000000e+00 : f32
    %376 = vector.broadcast %cst_135 : f32 to vector<8x32xf32>
    %377 = arith.addf %376, %375 : vector<8x32xf32>
    %cst_136 = arith.constant 5.000000e-01 : f32
    %378 = vector.broadcast %cst_136 : f32 to vector<8x32xf32>
    %379 = arith.mulf %378, %377 : vector<8x32xf32>
    %380 = arith.mulf %288, %379 : vector<8x32xf32>
    %c0_137 = arith.constant 0 : index
    %c0_138 = arith.constant 0 : index
    %381 = vector.load %arg14[%c0_137, %c0_138] : memref<32x32xf32, #tpu.memory_space<vmem>>, vector<32x32xf32>
    %cst_139 = arith.constant dense<0.000000e+00> : vector<8x32xf32>
    %382 = tpu.matmul %380, %381, %cst_139 {dimension_numbers = #tpu.dot_dimension_numbers<[1], [0], [0], [1], [0, 0, 1, 1], [], []>} : vector<8x32xf32>, vector<32x32xf32>, vector<8x32xf32> -> vector<8x32xf32>
    %c0_140 = arith.constant 0 : index
    %c0_141 = arith.constant 0 : index
    %383 = vector.load %arg15[%c0_140, %c0_141] : memref<1x32xf32, #tpu.memory_space<vmem>>, vector<1x32xf32>
    %384 = vector.broadcast %383 : vector<1x32xf32> to vector<8x32xf32>
    %385 = arith.addf %382, %384 : vector<8x32xf32>
    %c0_142 = arith.constant 0 : index
    %c0_143 = arith.constant 0 : index
    %386 = vector.load %arg18[%c0_142, %c0_143] : memref<1x1xf32, #tpu.memory_space<vmem>>, vector<1x1xf32>
    %387 = vector.broadcast %386 : vector<1x1xf32> to vector<8x32xf32>
    %388 = arith.mulf %387, %385 : vector<8x32xf32>
    %cst_144 = arith.constant 1.000000e+00 : f32
    %389 = vector.broadcast %cst_144 : f32 to vector<1x1xf32>
    %390 = arith.subf %389, %386 : vector<1x1xf32>
    %391 = vector.broadcast %390 : vector<1x1xf32> to vector<8x32xf32>
    %392 = arith.mulf %391, %47 : vector<8x32xf32>
    %393 = arith.addf %388, %392 : vector<8x32xf32>
    %394 = arith.mulf %367, %367 : vector<6x32xf32>
    %395 = arith.mulf %367, %394 : vector<6x32xf32>
    %cst_145 = arith.constant 4.471500e-02 : f32
    %396 = vector.broadcast %cst_145 : f32 to vector<6x32xf32>
    %397 = arith.mulf %396, %395 : vector<6x32xf32>
    %398 = arith.addf %367, %397 : vector<6x32xf32>
    %cst_146 = arith.constant 0.797884583 : f32
    %399 = vector.broadcast %cst_146 : f32 to vector<6x32xf32>
    %400 = arith.mulf %399, %398 : vector<6x32xf32>
    %401 = math.tanh %400 : vector<6x32xf32>
    %cst_147 = arith.constant 1.000000e+00 : f32
    %402 = vector.broadcast %cst_147 : f32 to vector<6x32xf32>
    %403 = arith.addf %402, %401 : vector<6x32xf32>
    %cst_148 = arith.constant 5.000000e-01 : f32
    %404 = vector.broadcast %cst_148 : f32 to vector<6x32xf32>
    %405 = arith.mulf %404, %403 : vector<6x32xf32>
    %406 = arith.mulf %367, %405 : vector<6x32xf32>
    %c0_149 = arith.constant 0 : index
    %c0_150 = arith.constant 0 : index
    %407 = vector.load %arg16[%c0_149, %c0_150] : memref<32x32xf32, #tpu.memory_space<vmem>>, vector<32x32xf32>
    %cst_151 = arith.constant dense<0.000000e+00> : vector<6x32xf32>
    %408 = tpu.matmul %406, %407, %cst_151 {dimension_numbers = #tpu.dot_dimension_numbers<[1], [0], [0], [1], [0, 0, 1, 1], [], []>} : vector<6x32xf32>, vector<32x32xf32>, vector<6x32xf32> -> vector<6x32xf32>
    %c0_152 = arith.constant 0 : index
    %c0_153 = arith.constant 0 : index
    %409 = vector.load %arg17[%c0_152, %c0_153] : memref<1x32xf32, #tpu.memory_space<vmem>>, vector<1x32xf32>
    %410 = vector.broadcast %409 : vector<1x32xf32> to vector<6x32xf32>
    %411 = arith.addf %408, %410 : vector<6x32xf32>
    %c0_154 = arith.constant 0 : index
    %c0_155 = arith.constant 0 : index
    %412 = vector.load %arg19[%c0_154, %c0_155] : memref<1x1xf32, #tpu.memory_space<vmem>>, vector<1x1xf32>
    %413 = vector.broadcast %412 : vector<1x1xf32> to vector<6x32xf32>
    %414 = arith.mulf %413, %411 : vector<6x32xf32>
    %cst_156 = arith.constant 1.000000e+00 : f32
    %415 = vector.broadcast %cst_156 : f32 to vector<1x1xf32>
    %416 = arith.subf %415, %412 : vector<1x1xf32>
    %417 = vector.broadcast %416 : vector<1x1xf32> to vector<6x32xf32>
    %418 = arith.mulf %417, %24 : vector<6x32xf32>
    %419 = arith.addf %414, %418 : vector<6x32xf32>
    %cst_157 = arith.constant 0.000000e+00 : f32
    %420 = vector.broadcast %cst_157 : f32 to vector<6x32xf32>
    %421 = arith.maximumf %419, %420 : vector<6x32xf32>
    %c0_158 = arith.constant 0 : index
    %c0_159 = arith.constant 0 : index
    %422 = vector.load %arg24[%c0_158, %c0_159] : memref<6x32xf32, #tpu.memory_space<vmem>>, vector<6x32xf32>
    tpu.vector_store %arg24[%c0_158, %c0_159], %421 {strides = array<i32>} : memref<6x32xf32, #tpu.memory_space<vmem>>, vector<6x32xf32>,
    %cst_160 = arith.constant 0.000000e+00 : f32
    %423 = vector.broadcast %cst_160 : f32 to vector<8x32xf32>
    %424 = arith.maximumf %393, %423 : vector<8x32xf32>
    %c0_161 = arith.constant 0 : index
    %c0_162 = arith.constant 0 : index
    %425 = vector.load %arg25[%c0_161, %c0_162] : memref<8x32xf32, #tpu.memory_space<vmem>>, vector<8x32xf32>
    tpu.vector_store %arg25[%c0_161, %c0_162], %424 {strides = array<i32>} : memref<8x32xf32, #tpu.memory_space<vmem>>, vector<8x32xf32>,
    %cst_163 = arith.constant 0.000000e+00 : f32
    %426 = vector.broadcast %cst_163 : f32 to vector<8x32xf32>
    %427 = arith.maximumf %70, %426 : vector<8x32xf32>
    %c0_164 = arith.constant 0 : index
    %c0_165 = arith.constant 0 : index
    %428 = vector.load %arg26[%c0_164, %c0_165] : memref<8x32xf32, #tpu.memory_space<vmem>>, vector<8x32xf32>
    tpu.vector_store %arg26[%c0_164, %c0_165], %427 {strides = array<i32>} : memref<8x32xf32, #tpu.memory_space<vmem>>, vector<8x32xf32>,
    %cst_166 = arith.constant 0.000000e+00 : f32
    %429 = vector.broadcast %cst_166 : f32 to vector<8x32xf32>
    %430 = arith.maximumf %93, %429 : vector<8x32xf32>
    %c0_167 = arith.constant 0 : index
    %c0_168 = arith.constant 0 : index
    %431 = vector.load %arg27[%c0_167, %c0_168] : memref<8x32xf32, #tpu.memory_space<vmem>>, vector<8x32xf32>
    tpu.vector_store %arg27[%c0_167, %c0_168], %430 {strides = array<i32>} : memref<8x32xf32, #tpu.memory_space<vmem>>, vector<8x32xf32>,
    return
  }
}

</mosaic_0001>

<bundles_post_ra>
// kernel: tpu_custom_call.1
= control target key start
LH: loop header
LB: loop body
LE: loop exit
PB: predicated region body
PF: predicated region fallthrough
CT: control target
= control target key end

     0   :  { %s3980_s0 = inlined_call_operand.hbm [shape: f32[6,32], index: 0, kind: input, shape index: {}]   ;;  %s3981_s1 = inlined_call_operand.hbm [shape: f32[8,32], index: 1, kind: input, shape index: {}]   ;;  %s3982_s2 = inlined_call_operand.hbm [shape: f32[8,32], index: 2, kind: input, shape index: {}]   ;;  %s3983_s3 = inlined_call_operand.hbm [shape: f32[8,32], index: 3, kind: input, shape index: {}]   ;;  %s3984_s4 = inlined_call_operand.hbm [shape: f32[1,32], index: 4, kind: input, shape index: {}]   ;;  %s3985_s5 = inlined_call_operand.hbm [shape: f32[1,32], index: 5, kind: input, shape index: {}]   ;;  %s3986_s6 = inlined_call_operand.hbm [shape: f32[32,96], index: 6, kind: input, shape index: {}]   ;;  %s3987_s7 = inlined_call_operand.hbm [shape: f32[1,96], index: 7, kind: input, shape index: {}]   ;;  %s3988_s8 = inlined_call_operand.vmem [shape: f32[32,96], index: 8, kind: input, shape index: {}]   ;;  %s3989_s9 = inlined_call_operand.hbm [shape: f32[1,96], index: 9, kind: input, shape index: {}]   ;;  %s3990_s10 = inlined_call_operand.hbm [shape: f32[32,96], index: 10, kind: input, shape index: {}]   ;;  %s3991_s11 = inlined_call_operand.hbm [shape: f32[1,96], index: 11, kind: input, shape index: {}]   ;;  %s3992_s12 = inlined_call_operand.hbm [shape: f32[32,96], index: 12, kind: input, shape index: {}]   ;;  %s3993_s13 = inlined_call_operand.hbm [shape: f32[1,96], index: 13, kind: input, shape index: {}]   ;;  %s3994_s14 = inlined_call_operand.hbm [shape: f32[32,32], index: 14, kind: input, shape index: {}]   ;;  %s3995_s15 = inlined_call_operand.hbm [shape: f32[1,32], index: 15, kind: input, shape index: {}]   ;;  %s3996_s16 = inlined_call_operand.vmem [shape: f32[32,32], index: 16, kind: input, shape index: {}]   ;;  %s3997_s17 = inlined_call_operand.vmem [shape: f32[1,32], index: 17, kind: input, shape index: {}]   ;;  %s3998_s18 = inlined_call_operand.<no memory space> [shape: f32[1,1], index: 18, kind: input, shape index: {}]   ;;  %s3999_s20 = inlined_call_operand.vmem [shape: f32[8,8], index: 20, kind: input, shape index: {}]   ;;  %s4000_s21 = inlined_call_operand.hbm [shape: f32[8,8], index: 21, kind: input, shape index: {}]   ;;  %s4001_s22 = inlined_call_operand.vmem [shape: f32[8,6], index: 22, kind: input, shape index: {}]   ;;  %s4002_s23 = inlined_call_operand.hbm [shape: f32[6,8], index: 23, kind: input, shape index: {}]   ;;  %s4003_s24 = inlined_call_operand.hbm [shape: f32[6,32], index: 24, kind: output, shape index: {0}]   ;;  %s4004_s25 = inlined_call_operand.hbm [shape: f32[8,32], index: 25, kind: output, shape index: {1}]   ;;  %s4005_s26 = inlined_call_operand.hbm [shape: f32[8,32], index: 26, kind: output, shape index: {2}]   ;;  %s4006_s27 = inlined_call_operand.hbm [shape: f32[8,32], index: 27, kind: output, shape index: {3}]   ;;  %s4007_s19 = inlined_call_operand.<no memory space> [shape: f32[1,1], index: 19, kind: input, shape index: {}]  }
   0x1   :  { %4020 = sst [smem:[#allocation49_spill]] %s3980_s0  ;;  %v33_v0 = vstv %s3998_s18  ;;  %v35_v1 = vstv %s4007_s19 }
   0x2   :  { %4021 = sst [smem:[#allocation50_spill]] %s3981_s1  ;;  %34 = vst [vmem:[#allocation2] sm:$0x1] %v33_v0  ;;  %36 = vst [vmem:[#allocation3] sm:$0x1] %v35_v1 }
   0x3   :  { %4022 = sst [smem:[#allocation51_spill]] %s3982_s2 }
   0x4   :  { %4023 = sst [smem:[#allocation52_spill]] %s3983_s3 }
   0x5   :  { %4024 = sst [smem:[#allocation53_spill]] %s3984_s4 }
   0x6   :  { %4025 = sst [smem:[#allocation54_spill]] %s3985_s5 }
   0x7   :  { %4026 = sst [smem:[#allocation55_spill]] %s3986_s6 }
   0x8   :  { %4027 = sst [smem:[#allocation56_spill]] %s3987_s7 }
   0x9   :  { %4028 = sst [smem:[#allocation57_spill]] %s3988_s8 }
   0xa   :  { %4029 = sst [smem:[#allocation58_spill]] %s3989_s9 }
   0xb   :  { %4030 = sst [smem:[#allocation59_spill]] %s3990_s10 }
   0xc   :  { %4031 = sst [smem:[#allocation60_spill]] %s3991_s11 }
   0xd   :  { %37 = vsyncpa [#allocation5], 0 }
   0xe   :  { %38 = vsyncpa [#allocation8], 0 }
   0xf   :  { %39 = vsyncpa [#allocation11], 0 }
  0x10   :  { %40 = vsyncpa [#allocation14], 0 }
  0x11   :  { %41 = vsyncpa [#allocation17], 0 }
  0x12   :  { %42 = vsyncpa [#allocation20], 0 }
  0x13   :  { %43 = vsyncpa [#allocation23], 0 }
  0x14   :  { %44 = vsyncpa [#allocation26], 0 }
  0x15   :  { %45 = vsyncpa [#allocation29], 0 }
  0x16   :  { %46 = vsyncpa [#allocation6], 0 }
  0x17   :  { %47 = vsyncpa [#allocation33], 0 }
  0x18   :  { %48 = vsyncpa [#allocation36], 0  ;;  %s3263_s9 = smov [#allocation7]   ;;  %s3264_s5 = smov [#allocation10]  }
  0x19   :  { %s65_s18 = sshll.u32 %s3263_s9, 4  ;;  %s85_s28 = sshll.u32 %s3264_s5, 4  ;;  %s66_s18 = int_to_ptr.vmem [resolvable:$true] %s65_s18  ;;  %s86_s28 = int_to_ptr.vmem [resolvable:$true] %s85_s28 }
  0x1a   :  { %s4032_s10 = sld [smem:[#allocation50_spill]] }
  0x20   :  { %s2777_s29 = scalar_lea.hbm %s4032_s10, 128 }
  0x21   :  { %p2778_p0 = scmp.ne.s32.totalorder %s4032_s10, %s2777_s29  ;;  %p2781_p1 = scmp.lt.u32.totalorder %s2777_s29, %s4032_s10 }
  0x23   :  { %p2783_p2 = pnand %p2781_p1, %p2778_p0 }
  0x25   :  { %2786 = shalt.err (!%p2783_p2)
}
  0x26   :  { %s2787_s3 = scalar_lea.vmem %s66_s18, 128  ;;  %p2792_p4 = scmp.lt.s32.totalorder %s66_s18, %s66_s18 }
  0x27   :  { %p2788_p3 = scmp.ne.s32.totalorder %s66_s18, %s2787_s3  ;;  %p2793_p5 = scmp.lt.s32.totalorder %s2787_s3, %s2787_s3 }
  0x29   :  { %p2794_p6 = por %p2793_p5, %p2792_p4 }
  0x2b   :  { %p2795_p7 = pnand %p2794_p6, %p2788_p3 }
  0x2d   :  { %2798 = shalt.err (!%p2795_p7)
}
  0x2e   :  { %68 = dma.hbm_to_vmem [thread:$0]  %s4032_s10, 128, %s66_s18, [#allocation8]  }
  0x2f   :  { %s4033_s9 = sld [smem:[#allocation52_spill]] }
  0x35   :  { %s2799_s5 = scalar_lea.hbm %s4033_s9, 128 }
  0x36   :  { %p2800_p8 = scmp.ne.s32.totalorder %s4033_s9, %s2799_s5  ;;  %p2803_p9 = scmp.lt.u32.totalorder %s2799_s5, %s4033_s9 }
  0x38   :  { %p2805_p10 = pnand %p2803_p9, %p2800_p8 }
  0x3a   :  { %2808 = shalt.err (!%p2805_p10)
}
  0x3b   :  { %s2809_s6 = scalar_lea.vmem %s86_s28, 128  ;;  %p2814_p12 = scmp.lt.s32.totalorder %s86_s28, %s86_s28 }
  0x3c   :  { %p2810_p11 = scmp.ne.s32.totalorder %s86_s28, %s2809_s6  ;;  %p2815_p13 = scmp.lt.s32.totalorder %s2809_s6, %s2809_s6 }
  0x3e   :  { %p2816_p0 = por %p2815_p13, %p2814_p12 }
  0x40   :  { %p2817_p1 = pnand %p2816_p0, %p2810_p11 }
  0x42   :  { %2820 = shalt.err (!%p2817_p1)
}
  0x43   :  { %88 = dma.hbm_to_vmem [thread:$0]  %s4033_s9, 128, %s86_s28, [#allocation11]  }
  0x44   :  { %s3265_s11 = smov [#allocation13]   ;;  %s3266_s3 = smov [#allocation16]  }
  0x45   :  { %s105_s2 = sshll.u32 %s3265_s11, 4  ;;  %s127_s7 = sshll.u32 %s3266_s3, 4  ;;  %s106_s2 = int_to_ptr.vmem [resolvable:$true] %s105_s2  ;;  %s128_s7 = int_to_ptr.vmem [resolvable:$true] %s127_s7 }
  0x46   :  { %s4034_s30 = sld [smem:[#allocation54_spill]] }
  0x4c   :  { %s2821_s5 = scalar_lea.hbm %s4034_s30, 16 }
  0x4d   :  { %p2822_p2 = scmp.ne.s32.totalorder %s4034_s30, %s2821_s5  ;;  %p2825_p3 = scmp.lt.u32.totalorder %s2821_s5, %s4034_s30 }
  0x4f   :  { %p2827_p4 = pnand %p2825_p3, %p2822_p2 }
  0x51   :  { %2830 = shalt.err (!%p2827_p4)
}
  0x52   :  { %s2831_s28 = scalar_lea.vmem %s106_s2, 16  ;;  %s2835_s9 = scalar_lea.vmem %s106_s2, 32 }
  0x53   :  { %p2832_p5 = scmp.ne.s32.totalorder %s106_s2, %s2831_s28  ;;  %p2836_p6 = scmp.lt.s32.totalorder %s106_s2, %s106_s2 }
  0x54   :  { %p2837_p7 = scmp.lt.s32.totalorder %s2835_s9, %s2831_s28 }
  0x56   :  { %p2838_p8 = por %p2837_p7, %p2836_p6 }
  0x58   :  { %p2839_p9 = pnand %p2838_p8, %p2832_p5 }
  0x5a   :  { %2842 = shalt.err (!%p2839_p9)
}
  0x5b   :  { %108 = dma.hbm_to_vmem [thread:$0]  %s4034_s30, 16, %s106_s2, [#allocation14]  }
  0x5c   :  { %s4035_s3 = sld [smem:[#allocation56_spill]] }
  0x62   :  { %s2843_s4 = scalar_lea.hbm %s4035_s3, 16 }
  0x63   :  { %p2844_p10 = scmp.ne.s32.totalorder %s4035_s3, %s2843_s4  ;;  %p2847_p11 = scmp.lt.u32.totalorder %s2843_s4, %s4035_s3 }
  0x65   :  { %p2849_p12 = pnand %p2847_p11, %p2844_p10 }
  0x67   :  { %2852 = shalt.err (!%p2849_p12)
}
  0x68   :  { %s2853_s29 = scalar_lea.vmem %s128_s7, 16  ;;  %s2857_s1 = scalar_lea.vmem %s128_s7, 32 }
  0x69   :  { %p2854_p13 = scmp.ne.s32.totalorder %s128_s7, %s2853_s29  ;;  %p2858_p0 = scmp.lt.s32.totalorder %s128_s7, %s128_s7 }
  0x6a   :  { %p2859_p1 = scmp.lt.s32.totalorder %s2857_s1, %s2853_s29 }
  0x6c   :  { %p2860_p2 = por %p2859_p1, %p2858_p0 }
  0x6e   :  { %p2861_p3 = pnand %p2860_p2, %p2854_p13 }
  0x70   :  { %2864 = shalt.err (!%p2861_p3)
}
  0x71   :  { %130 = dma.hbm_to_vmem [thread:$0]  %s4035_s3, 16, %s128_s7, [#allocation17]  }
  0x72   :  { %s3267_s28 = smov [#allocation19]   ;;  %s3268_s6 = smov [#allocation22]  }
  0x73   :  { %s148_s9 = sshll.u32 %s3267_s28, 4  ;;  %s170_s18 = sshll.u32 %s3268_s6, 4  ;;  %s149_s9 = int_to_ptr.vmem [resolvable:$true] %s148_s9  ;;  %s3488_s18 = int_to_ptr.vmem [resolvable:$true] %s170_s18 }
  0x74   :  { %s4036_s4 = sld [smem:[#allocation59_spill]] }
  0x7a   :  { %s2865_s8 = scalar_lea.hbm %s4036_s4, 512 }
  0x7b   :  { %p2866_p4 = scmp.ne.s32.totalorder %s4036_s4, %s2865_s8  ;;  %p2869_p5 = scmp.lt.u32.totalorder %s2865_s8, %s4036_s4 }
  0x7d   :  { %p2871_p6 = pnand %p2869_p5, %p2866_p4 }
  0x7f   :  { %2874 = shalt.err (!%p2871_p6)
}
  0x80   :  { %s2875_s7 = scalar_lea.vmem %s149_s9, 512  ;;  %p2880_p8 = scmp.lt.s32.totalorder %s149_s9, %s149_s9 }
  0x81   :  { %p2876_p7 = scmp.ne.s32.totalorder %s149_s9, %s2875_s7  ;;  %p2881_p9 = scmp.lt.s32.totalorder %s2875_s7, %s2875_s7 }
  0x83   :  { %p2882_p10 = por %p2881_p9, %p2880_p8 }
  0x85   :  { %p2883_p11 = pnand %p2882_p10, %p2876_p7 }
  0x87   :  { %2886 = shalt.err (!%p2883_p11)
}
  0x88   :  { %s3269_s3 = smov 128   ;;  %s3270_s1 = smov 8  }
  0x89   :  { %154 = dma.hbm_to_vmem [thread:$0]  %s4036_s4, 512, %s149_s9, [#allocation20], %s3269_s3, %s3269_s3, %s3270_s1  }
  0x8a   :  { %s2887_s10 = scalar_lea.hbm %s3992_s12, 512 }
  0x8b   :  { %p2888_p12 = scmp.ne.s32.totalorder %s3992_s12, %s2887_s10  ;;  %p2891_p13 = scmp.lt.u32.totalorder %s2887_s10, %s3992_s12 }
  0x8d   :  { %p2893_p0 = pnand %p2891_p13, %p2888_p12 }
  0x8f   :  { %2896 = shalt.err (!%p2893_p0)
}
  0x90   :  { %s2897_s0 = scalar_lea.vmem %s3488_s18, 512  ;;  %p2902_p2 = scmp.lt.s32.totalorder %s3488_s18, %s3488_s18 }
  0x91   :  { %p2898_p1 = scmp.ne.s32.totalorder %s3488_s18, %s2897_s0  ;;  %p2903_p3 = scmp.lt.s32.totalorder %s2897_s0, %s2897_s0 }
  0x93   :  { %p2904_p4 = por %p2903_p3, %p2902_p2 }
  0x95   :  { %p2905_p5 = pnand %p2904_p4, %p2898_p1 }
  0x97   :  { %2908 = shalt.err (!%p2905_p5)
}
  0x98   :  { %176 = dma.hbm_to_vmem [thread:$0]  %s3992_s12, 512, %s3488_s18, [#allocation23], %s3269_s3, %s3269_s3, %s3270_s1  }
  0x99   :  { %s3271_s29 = smov [#allocation25]   ;;  %s3272_s2 = smov [#allocation28]  }
  0x9a   :  { %s192_s7 = sshll.u32 %s3271_s29, 4  ;;  %s225_s30 = sshll.u32 %s3272_s2, 4  ;;  %s193_s7 = int_to_ptr.vmem [resolvable:$true] %s192_s7  ;;  %s226_s30 = int_to_ptr.vmem [resolvable:$true] %s225_s30 }
  0x9b   :  { %s2909_s10 = scalar_lea.hbm %s3994_s14, 512 }
  0x9c   :  { %p2910_p6 = scmp.ne.s32.totalorder %s3994_s14, %s2909_s10  ;;  %p2913_p7 = scmp.lt.u32.totalorder %s2909_s10, %s3994_s14 }
  0x9e   :  { %p2915_p8 = pnand %p2913_p7, %p2910_p6 }
  0xa0   :  { %2918 = shalt.err (!%p2915_p8)
}
  0xa1   :  { %s2919_s12 = scalar_lea.vmem %s193_s7, 512  ;;  %p2924_p10 = scmp.lt.s32.totalorder %s193_s7, %s193_s7 }
  0xa2   :  { %p2920_p9 = scmp.ne.s32.totalorder %s193_s7, %s2919_s12  ;;  %p2925_p11 = scmp.lt.s32.totalorder %s2919_s12, %s2919_s12 }
  0xa4   :  { %p2926_p12 = por %p2925_p11, %p2924_p10 }
  0xa6   :  { %p2927_p13 = pnand %p2926_p12, %p2920_p9 }
  0xa8   :  { %2930 = shalt.err (!%p2927_p13)
}
  0xa9   :  { %198 = dma.hbm_to_vmem [thread:$0]  %s3994_s14, 512, %s193_s7, [#allocation26], %s3269_s3, %s3269_s3, %s3270_s1  }
  0xaa   :  { %s2931_s29 = scalar_lea.hbm %s4000_s21, 128 }
  0xab   :  { %p2932_p0 = scmp.ne.s32.totalorder %s4000_s21, %s2931_s29  ;;  %p2935_p1 = scmp.lt.u32.totalorder %s2931_s29, %s4000_s21 }
  0xad   :  { %p2937_p2 = pnand %p2935_p1, %p2932_p0 }
  0xaf   :  { %2940 = shalt.err (!%p2937_p2)
}
  0xb0   :  { %s2941_s11 = scalar_lea.vmem %s226_s30, 128  ;;  %p2946_p4 = scmp.lt.s32.totalorder %s226_s30, %s226_s30 }
  0xb1   :  { %p2942_p3 = scmp.ne.s32.totalorder %s226_s30, %s2941_s11  ;;  %p2947_p5 = scmp.lt.s32.totalorder %s2941_s11, %s2941_s11 }
  0xb3   :  { %p2948_p6 = por %p2947_p5, %p2946_p4 }
  0xb5   :  { %p2949_p7 = pnand %p2948_p6, %p2942_p3 }
  0xb7   :  { %2952 = shalt.err (!%p2949_p7)
}
  0xb8   :  { %228 = dma.hbm_to_vmem [thread:$0]  %s4000_s21, 128, %s226_s30, [#allocation29]  }
  0xb9   :  { %s3273_s8 = smov [#allocation4]   ;;  %s3274_s19 = smov [#allocation9]  }
  0xba   :  { %s55_s5 = sshll.u32 %s3273_s8, 4  ;;  %s75_s12 = sshll.u32 %s3274_s19, 4  ;;  %s56_s5 = int_to_ptr.vmem [resolvable:$true] %s55_s5  ;;  %s76_s12 = int_to_ptr.vmem [resolvable:$true] %s75_s12 }
  0xbb   :  { %s4037_s9 = sld [smem:[#allocation49_spill]] }
  0xc1   :  { %s2953_s4 = scalar_lea.hbm %s4037_s9, 128 }
  0xc2   :  { %p2954_p8 = scmp.ne.s32.totalorder %s4037_s9, %s2953_s4  ;;  %p2957_p9 = scmp.lt.u32.totalorder %s2953_s4, %s4037_s9 }
  0xc4   :  { %p2959_p10 = pnand %p2957_p9, %p2954_p8 }
  0xc6   :  { %2962 = shalt.err (!%p2959_p10)
}
  0xc7   :  { %s2963_s21 = scalar_lea.vmem %s56_s5, 128  ;;  %p2968_p12 = scmp.lt.s32.totalorder %s56_s5, %s56_s5 }
  0xc8   :  { %p2964_p11 = scmp.ne.s32.totalorder %s56_s5, %s2963_s21  ;;  %p2969_p13 = scmp.lt.s32.totalorder %s2963_s21, %s2963_s21 }
  0xca   :  { %p2970_p0 = por %p2969_p13, %p2968_p12 }
  0xcc   :  { %p2971_p1 = pnand %p2970_p0, %p2964_p11 }
  0xce   :  { %2974 = shalt.err (!%p2971_p1)
}
  0xcf   :  { %58 = dma.hbm_to_vmem [thread:$0]  %s4037_s9, 128, %s56_s5, [#allocation5]  }
  0xd0   :  { %s4038_s7 = sld [smem:[#allocation51_spill]] }
  0xd6   :  { %s2975_s8 = scalar_lea.hbm %s4038_s7, 128 }
  0xd7   :  { %p2976_p2 = scmp.ne.s32.totalorder %s4038_s7, %s2975_s8  ;;  %p2979_p3 = scmp.lt.u32.totalorder %s2975_s8, %s4038_s7 }
  0xd9   :  { %p2981_p4 = pnand %p2979_p3, %p2976_p2 }
  0xdb   :  { %2984 = shalt.err (!%p2981_p4)
}
  0xdc   :  { %s2985_s29 = scalar_lea.vmem %s76_s12, 128  ;;  %p2990_p6 = scmp.lt.s32.totalorder %s76_s12, %s76_s12 }
  0xdd   :  { %p2986_p5 = scmp.ne.s32.totalorder %s76_s12, %s2985_s29  ;;  %p2991_p7 = scmp.lt.s32.totalorder %s2985_s29, %s2985_s29 }
  0xdf   :  { %p2992_p8 = por %p2991_p7, %p2990_p6 }
  0xe1   :  { %p2993_p9 = pnand %p2992_p8, %p2986_p5 }
  0xe3   :  { %2996 = shalt.err (!%p2993_p9)
}
  0xe4   :  { %78 = dma.hbm_to_vmem [thread:$0]  %s4038_s7, 128, %s76_s12, [#allocation8]  }
  0xe5   :  { %s3275_s2 = smov [#allocation12]   ;;  %s3276_s6 = smov [#allocation15]  }
  0xe6   :  { %s95_s28 = sshll.u32 %s3275_s2, 4  ;;  %s114_s21 = sshll.u32 %s3276_s6, 4  ;;  %s96_s28 = int_to_ptr.vmem [resolvable:$true] %s95_s28  ;;  %s3576_s21 = int_to_ptr.vmem [resolvable:$true] %s114_s21 }
  0xe7   :  { %s4039_s11 = sld [smem:[#allocation53_spill]] }
  0xed   :  { %s2997_s14 = scalar_lea.hbm %s4039_s11, 16 }
  0xee   :  { %p2998_p10 = scmp.ne.s32.totalorder %s4039_s11, %s2997_s14  ;;  %p3001_p11 = scmp.lt.u32.totalorder %s2997_s14, %s4039_s11 }
  0xf0   :  { %p3003_p12 = pnand %p3001_p11, %p2998_p10 }
  0xf2   :  { %3006 = shalt.err (!%p3003_p12)
}
  0xf3   :  { %s3007_s12 = scalar_lea.vmem %s96_s28, 16  ;;  %s3011_s7 = scalar_lea.vmem %s96_s28, 32 }
  0xf4   :  { %p3008_p13 = scmp.ne.s32.totalorder %s96_s28, %s3007_s12  ;;  %p3012_p0 = scmp.lt.s32.totalorder %s96_s28, %s96_s28 }
  0xf5   :  { %p3013_p1 = scmp.lt.s32.totalorder %s3011_s7, %s3007_s12 }
  0xf7   :  { %p3014_p2 = por %p3013_p1, %p3012_p0 }
  0xf9   :  { %p3015_p3 = pnand %p3014_p2, %p3008_p13 }
  0xfb   :  { %3018 = shalt.err (!%p3015_p3)
}
  0xfc   :  { %98 = dma.hbm_to_vmem [thread:$0]  %s4039_s11, 16, %s96_s28, [#allocation11]  }
  0xfd   :  { %s4040_s2 = sld [smem:[#allocation55_spill]] }
 0x103   :  { %s3019_s6 = scalar_lea.hbm %s4040_s2, 512 }
 0x104   :  { %p3020_p4 = scmp.ne.s32.totalorder %s4040_s2, %s3019_s6  ;;  %p3023_p5 = scmp.lt.u32.totalorder %s3019_s6, %s4040_s2 }
 0x106   :  { %p3025_p6 = pnand %p3023_p5, %p3020_p4 }
 0x108   :  { %3028 = shalt.err (!%p3025_p6)
}
 0x109   :  { %s3029_s19 = scalar_lea.vmem %s3576_s21, 512  ;;  %p3034_p8 = scmp.lt.s32.totalorder %s3576_s21, %s3576_s21 }
 0x10a   :  { %p3030_p7 = scmp.ne.s32.totalorder %s3576_s21, %s3029_s19  ;;  %p3035_p9 = scmp.lt.s32.totalorder %s3029_s19, %s3029_s19 }
 0x10c   :  { %p3036_p10 = por %p3035_p9, %p3034_p8 }
 0x10e   :  { %p3037_p11 = pnand %p3036_p10, %p3030_p7 }
 0x110   :  { %3040 = shalt.err (!%p3037_p11)
}
 0x111   :  { %120 = dma.hbm_to_vmem [thread:$0]  %s4040_s2, 512, %s3576_s21, [#allocation14], %s3269_s3, %s3269_s3, %s3270_s1  }
 0x112   :  { %s3277_s18 = smov [#allocation18]   ;;  %s3278_s12 = smov [#allocation21]  }
 0x113   :  { %s139_s0 = sshll.u32 %s3277_s18, 4  ;;  %s161_s7 = sshll.u32 %s3278_s12, 4  ;;  %s140_s0 = int_to_ptr.vmem [resolvable:$true] %s139_s0  ;;  %s162_s7 = int_to_ptr.vmem [resolvable:$true] %s161_s7 }
 0x114   :  { %s4041_s5 = sld [smem:[#allocation58_spill]] }
 0x11a   :  { %s3041_s9 = scalar_lea.hbm %s4041_s5, 16 }
 0x11b   :  { %p3042_p12 = scmp.ne.s32.totalorder %s4041_s5, %s3041_s9  ;;  %p3045_p13 = scmp.lt.u32.totalorder %s3041_s9, %s4041_s5 }
 0x11d   :  { %p3047_p0 = pnand %p3045_p13, %p3042_p12 }
 0x11f   :  { %3050 = shalt.err (!%p3047_p0)
}
 0x120   :  { %s3051_s3 = scalar_lea.vmem %s140_s0, 16  ;;  %s3055_s1 = scalar_lea.vmem %s140_s0, 32 }
 0x121   :  { %p3052_p1 = scmp.ne.s32.totalorder %s140_s0, %s3051_s3  ;;  %p3056_p2 = scmp.lt.s32.totalorder %s140_s0, %s140_s0 }
 0x122   :  { %p3057_p3 = scmp.lt.s32.totalorder %s3055_s1, %s3051_s3 }
 0x124   :  { %p3058_p4 = por %p3057_p3, %p3056_p2 }
 0x126   :  { %p3059_p5 = pnand %p3058_p4, %p3052_p1 }
 0x128   :  { %3062 = shalt.err (!%p3059_p5)
}
 0x129   :  { %142 = dma.hbm_to_vmem [thread:$0]  %s4041_s5, 16, %s140_s0, [#allocation17]  }
 0x12a   :  { %s4042_s28 = sld [smem:[#allocation60_spill]] }
 0x130   :  { %s3063_s11 = scalar_lea.hbm %s4042_s28, 16 }
 0x131   :  { %p3064_p6 = scmp.ne.s32.totalorder %s4042_s28, %s3063_s11  ;;  %p3067_p7 = scmp.lt.u32.totalorder %s3063_s11, %s4042_s28 }
 0x133   :  { %p3069_p8 = pnand %p3067_p7, %p3064_p6 }
 0x135   :  { %3072 = shalt.err (!%p3069_p8)
}
 0x136   :  { %s3073_s9 = scalar_lea.vmem %s162_s7, 16  ;;  %s3077_s6 = scalar_lea.vmem %s162_s7, 32 }
 0x137   :  { %p3074_p9 = scmp.ne.s32.totalorder %s162_s7, %s3073_s9  ;;  %p3078_p10 = scmp.lt.s32.totalorder %s162_s7, %s162_s7 }
 0x138   :  { %p3079_p11 = scmp.lt.s32.totalorder %s3077_s6, %s3073_s9 }
 0x13a   :  { %p3080_p12 = por %p3079_p11, %p3078_p10 }
 0x13c   :  { %p3081_p13 = pnand %p3080_p12, %p3074_p9 }
 0x13e   :  { %3084 = shalt.err (!%p3081_p13)
}
 0x13f   :  { %164 = dma.hbm_to_vmem [thread:$0]  %s4042_s28, 16, %s162_s7, [#allocation20]  }
 0x140   :  { %s3279_s30 = smov [#allocation24]   ;;  %s3280_s14 = smov [#allocation27]  }
 0x141   :  { %s183_s10 = sshll.u32 %s3279_s30, 4  ;;  %s205_s3 = sshll.u32 %s3280_s14, 4  ;;  %s184_s10 = int_to_ptr.vmem [resolvable:$true] %s183_s10  ;;  %s206_s3 = int_to_ptr.vmem [resolvable:$true] %s205_s3 }
 0x142   :  { %s3085_s2 = scalar_lea.hbm %s3993_s13, 16 }
 0x143   :  { %p3086_p0 = scmp.ne.s32.totalorder %s3993_s13, %s3085_s2  ;;  %p3089_p1 = scmp.lt.u32.totalorder %s3085_s2, %s3993_s13 }
 0x145   :  { %p3091_p2 = pnand %p3089_p1, %p3086_p0 }
 0x147   :  { %3094 = shalt.err (!%p3091_p2)
}
 0x148   :  { %s3095_s7 = scalar_lea.vmem %s184_s10, 16  ;;  %s3099_s28 = scalar_lea.vmem %s184_s10, 32 }
 0x149   :  { %p3096_p3 = scmp.ne.s32.totalorder %s184_s10, %s3095_s7  ;;  %p3100_p4 = scmp.lt.s32.totalorder %s184_s10, %s184_s10 }
 0x14a   :  { %p3101_p5 = scmp.lt.s32.totalorder %s3099_s28, %s3095_s7 }
 0x14c   :  { %p3102_p6 = por %p3101_p5, %p3100_p4 }
 0x14e   :  { %p3103_p7 = pnand %p3102_p6, %p3096_p3 }
 0x150   :  { %3106 = shalt.err (!%p3103_p7)
}
 0x151   :  { %186 = dma.hbm_to_vmem [thread:$0]  %s3993_s13, 16, %s184_s10, [#allocation23]  }
 0x152   :  { %s3107_s6 = scalar_lea.hbm %s3995_s15, 16 }
 0x153   :  { %p3108_p8 = scmp.ne.s32.totalorder %s3995_s15, %s3107_s6  ;;  %p3111_p9 = scmp.lt.u32.totalorder %s3107_s6, %s3995_s15 }
 0x155   :  { %p3113_p10 = pnand %p3111_p9, %p3108_p8 }
 0x157   :  { %3116 = shalt.err (!%p3113_p10)
}
 0x158   :  { %s3117_s1 = scalar_lea.vmem %s206_s3, 16  ;;  %s3121_s21 = scalar_lea.vmem %s206_s3, 32 }
 0x159   :  { %p3118_p11 = scmp.ne.s32.totalorder %s206_s3, %s3117_s1  ;;  %p3122_p12 = scmp.lt.s32.totalorder %s206_s3, %s206_s3 }
 0x15a   :  { %p3123_p13 = scmp.lt.s32.totalorder %s3121_s21, %s3117_s1 }
 0x15c   :  { %p3124_p0 = por %p3123_p13, %p3122_p12 }
 0x15e   :  { %p3125_p1 = pnand %p3124_p0, %p3118_p11 }
 0x160   :  { %3128 = shalt.err (!%p3125_p1)
}
 0x161   :  { %208 = dma.hbm_to_vmem [thread:$0]  %s3995_s15, 16, %s206_s3, [#allocation26]  }
 0x162   :  { %s3281_s2 = smov [#allocation30]   ;;  %s3129_s18 = scalar_lea.hbm %s4002_s23, 128 }
 0x163   :  { %s237_s8 = sshll.u32 %s3281_s2, 4  ;;  %p3130_p2 = scmp.ne.s32.totalorder %s4002_s23, %s3129_s18  ;;  %s238_s8 = int_to_ptr.vmem [resolvable:$true] %s237_s8 }
 0x164   :  { %p3133_p3 = scmp.lt.u32.totalorder %s3129_s18, %s4002_s23 }
 0x166   :  { %p3135_p4 = pnand %p3133_p3, %p3130_p2 }
 0x168   :  { %3138 = shalt.err (!%p3135_p4)
}
 0x169   :  { %s3139_s29 = scalar_lea.vmem %s238_s8, 128  ;;  %p3144_p6 = scmp.lt.s32.totalorder %s238_s8, %s238_s8 }
 0x16a   :  { %p3140_p5 = scmp.ne.s32.totalorder %s238_s8, %s3139_s29  ;;  %p3145_p7 = scmp.lt.s32.totalorder %s3139_s29, %s3139_s29 }
 0x16c   :  { %p3146_p8 = por %p3145_p7, %p3144_p6 }
 0x16e   :  { %p3147_p9 = pnand %p3146_p8, %p3140_p5 }
 0x170   :  { %3150 = shalt.err (!%p3147_p9)
}
 0x171   :  { %240 = dma.hbm_to_vmem [thread:$0]  %s4002_s23, 128, %s238_s8, [#allocation29]  }
 0x172   :  { %3239 = dma.done.wait [#allocation5], 128  }
 0x173   :  { %3240 = vsyncadd [#allocation5], 4294967168 }
 0x174   :  { %3241 = dma.done.wait [#allocation8], 256  }
 0x175   :  { %3242 = vsyncadd [#allocation8], 4294967040 }
 0x176   :  { %3243 = dma.done.wait [#allocation11], 144  }
 0x177   :  { %3244 = vsyncadd [#allocation11], 4294967152 }
 0x178   :  { %3245 = dma.done.wait [#allocation14], 528  }
 0x179   :  { %3246 = vsyncadd [#allocation14], 4294966768 }
 0x17a   :  { %3247 = dma.done.wait [#allocation17], 32  }
 0x17b   :  { %3248 = vsyncadd [#allocation17], 4294967264 }
 0x17c   :  { %3249 = dma.done.wait [#allocation20], 528  }
 0x17d   :  { %3250 = vsyncadd [#allocation20], 4294966768 }
 0x17e   :  { %3251 = dma.done.wait [#allocation23], 528  }
 0x17f   :  { %3252 = vsyncadd [#allocation23], 4294966768 }
 0x180   :  { %3253 = dma.done.wait [#allocation26], 528  }
 0x181   :  { %3254 = vsyncadd [#allocation26], 4294966768 }
 0x182   :  { %3255 = dma.done.wait [#allocation29], 256  }
 0x183   :  { %3256 = vsyncadd [#allocation29], 4294967040  ;;  %v3282_v2 = vmov 0.0|0.0   ;;  %vm3283_vm0 = vmmov 0   ;;  %v3284_v3 = vmov 0.0   ;;  %v406_v4 = vld [vmem:[#allocation15] sm:$0xff] }
 0x184   :  { %2664 = vmatprep.subr.bf16.mxu0 %v3282_v2  ;;  %2526 = vmatprep.mubr.msk.f32.mxu0 %vm3283_vm0, %v3284_v3  ;;  %v407_v5 = vld [vmem:[#allocation15 + $0x8] sm:$0xff]  ;;  %v408_v6 = vld [vmem:[#allocation15 + $0x10] sm:$0xff]  ;;  %vm295_vm1 = vcmask 259072   ;;  %v409_v8 = vld [vmem:[#allocation15 + $0x18] sm:$0xff]  ;;  %s4043_s6 = sld [smem:[#allocation57_spill]]  ;;  %vm333_vm2 = vcmask 261120  }
 0x185   :  { %2670 = vmatprep.subr.bf16.mxu1 %v3282_v2  ;;  %2537 = vmatprep.mubr.msk.f32.mxu1 %vm3283_vm0, %v3284_v3  ;;  %v2665_v7 = vpack.c.bf16 %v407_v5, %v406_v4  ;;  %v294_v9 = vld [vmem:[#allocation4] sm:$0x3f]  ;;  %v2668_v12 = vpack.c.bf16 %v409_v8, %v408_v6  ;;  %v358_v19 = vld [vmem:[#allocation9] sm:$0xff]  ;;  %v332_v20 = vld [vmem:[#allocation7] sm:$0xff]  ;;  %s3285_s13 = smov 80   ;;  %s3286_s10 = smov 96  }
 0x186   :  { %v296_v13 = vsel %vm295_vm1, %v294_v9, 0.0  ;;  %v359_v22 = vsel %vm333_vm2, %v358_v19, 0.0  ;;  %v334_v23 = vsel %vm333_vm2, %v332_v20, 0.0  ;;  %v382_v26 = vld [vmem:[#allocation10] sm:$0xff]  ;;  %s3287_s2 = smov 112   ;;  %s3288_s8 = smov 64  }
 0x187   :  { %2666 = vmatpush3.bf16.msra.mxu0 %v2665_v7  ;;  %v297_v16 = vrot.slane %v296_v13, 4  ;;  %v360_v24 = vrot.slane %v359_v22, 4  ;;  %v335_v25 = vrot.slane %v334_v23, 4  ;;  %v383_v28 = vsel %vm333_vm2, %v382_v26, 0.0 }
 0x188   :  { %2667 = vmatprep.subr.bf16.mxu0 %v3282_v2  ;;  %v384_v31 = vrot.slane %v383_v28, 4  ;;  %vm750_vm3 = vcmask 130048   ;;  %vm988_vm4 = vcmask 64512   ;;  %vm1844_vm5 = vcmask 62464  }
 0x189   :  { %v298_v21 = vadd.f32 %v297_v16, %v296_v13  ;;  %v361_v29 = vadd.f32 %v360_v24, %v359_v22  ;;  %v336_v30 = vadd.f32 %v335_v25, %v334_v23  ;;  %vm996_vm6 = vcmask 48128  }
 0x18a   :  { %v490_v10 = vld [vmem:[%s4043_s6] sm:$0xff]  ;;  %v491_v11 = vld [vmem:[%s4043_s6 + $0x8] sm:$0xff]  ;;  %v492_v15 = vld [vmem:[%s4043_s6 + $0x10] sm:$0xff]  ;;  %v385_v35 = vadd.f32 %v384_v31, %v383_v28  ;;  %vm1182_vm7 = vcmask 1045504  }
 0x18b   :  { %v2671_v14 = vpack.c.bf16 %v491_v11, %v490_v10  ;;  %v493_v17 = vld [vmem:[%s4043_s6 + $0x18] sm:$0xff]  ;;  %2669 = vmatpush3.bf16.msra.mxu0 %v2668_v12  ;;  %v299_v27 = vrot.slane %v298_v21, 2  ;;  %v362_v33 = vrot.slane %v361_v29, 2  ;;  %v337_v34 = vrot.slane %v336_v30, 2 }
 0x18c   :  { %v2674_v18 = vpack.c.bf16 %v493_v17, %v492_v15  ;;  %2676 = vmatprep.subr.bf16.mxu0 %v3282_v2  ;;  %v386_v39 = vrot.slane %v385_v35, 2 }
 0x18d   :  { %2672 = vmatpush3.bf16.msra.mxu1 %v2671_v14  ;;  %v300_v32 = vadd.f32 %v299_v27, %v298_v21  ;;  %v363_v37 = vadd.f32 %v362_v33, %v361_v29  ;;  %v338_v38 = vadd.f32 %v337_v34, %v336_v30 }
 0x18e   :  { %2673 = vmatprep.subr.bf16.mxu1 %v3282_v2  ;;  %v387_v43 = vadd.f32 %v386_v39, %v385_v35  ;;  %v2410_v35 = vld [vmem:[#allocation12] ss:$0 sm:$0xff]  ;;  %v2411_v39 = vld [vmem:[#allocation13] ss:$0 sm:$0xff] }
 0x18f   :  { %v301_v36 = vrot.slane %v300_v32, 1  ;;  %v364_v41 = vrot.slane %v363_v37, 1  ;;  %v339_v42 = vrot.slane %v338_v38, 1 }
 0x190   :  { %v388_v47 = vrot.slane %v387_v43, 1 }
 0x191   :  { %2675 = vmatpush3.bf16.msra.mxu1 %v2674_v18  ;;  %v302_v40 = vadd.f32 %v301_v36, %v300_v32  ;;  %v365_v45 = vadd.f32 %v364_v41, %v363_v37  ;;  %v340_v46 = vadd.f32 %v339_v42, %v338_v38  ;;  %v574_v37 = vld [vmem:[#allocation19] sm:$0xff]  ;;  %v575_v38 = vld [vmem:[#allocation19 + $0x8] sm:$0xff] }
 0x192   :  { %2682 = vmatprep.subr.bf16.mxu1 %v3282_v2  ;;  %v389_v51 = vadd.f32 %v388_v47, %v387_v43  ;;  %v2677_v43 = vpack.c.bf16 %v575_v38, %v574_v37 }
 0x193   :  { %v304_v44 = vmul.f32 0.16666667, %v302_v40  ;;  %v366_v49 = vmul.f32 0.125, %v365_v45  ;;  %v342_v50 = vmul.f32 0.125, %v340_v46 }
 0x194   :  { %v390_v55 = vmul.f32 0.125, %v389_v51  ;;  %v658_v51 = vld [vmem:[#allocation22] sm:$0xff] }
 0x195   :  { %v305_v48 = vsub.f32 %v294_v9, %v304_v44  ;;  %v367_v53 = vsub.f32 %v358_v19, %v366_v49  ;;  %v343_v54 = vsub.f32 %v332_v20, %v342_v50  ;;  %v576_v44 = vld [vmem:[#allocation19 + $0x10] sm:$0xff]  ;;  %v577_v49 = vld [vmem:[#allocation19 + $0x18] sm:$0xff] }
 0x196   :  { %v391_v60 = vsub.f32 %v382_v26, %v390_v55 }
 0x197   :  { %v306_v52 = vmul.f32 %v305_v48, %v305_v48  ;;  %v368_v58 = vmul.f32 %v367_v53, %v367_v53  ;;  %v344_v59 = vmul.f32 %v343_v54, %v343_v54 }
 0x198   :  { %v392_v0 = vmul.f32 %v391_v60, %v391_v60 }
 0x199   :  { %v307_v56 = vsel %vm295_vm1, %v306_v52, 0.0  ;;  %v369_v62 = vsel %vm333_vm2, %v368_v58, 0.0  ;;  %v345_v63 = vsel %vm333_vm2, %v344_v59, 0.0  ;;  %v659_v52 = vld [vmem:[#allocation22 + $0x8] sm:$0xff]  ;;  %v660_v59 = vld [vmem:[#allocation22 + $0x10] sm:$0xff] }
 0x19a   :  { %v308_v57 = vrot.slane %v307_v56, 4  ;;  %v370_v1 = vrot.slane %v369_v62, 4  ;;  %v346_v4 = vrot.slane %v345_v63, 4  ;;  %v393_v6 = vsel %vm333_vm2, %v392_v0, 0.0 }
 0x19b   :  { %v394_v9 = vrot.slane %v393_v6, 4  ;;  %v2683_v58 = vpack.c.bf16 %v659_v52, %v658_v51  ;;  %v3801_v51 = vld [vmem:[%s4001_s22] sm:$0xff] }
 0x19c   :  { %v309_v61 = vadd.f32 %v308_v57, %v307_v56  ;;  %v371_v7 = vadd.f32 %v370_v1, %v369_v62  ;;  %v347_v8 = vadd.f32 %v346_v4, %v345_v63  ;;  %v2680_v57 = vpack.c.bf16 %v577_v49, %v576_v44  ;;  %v3794_v44 = vld [vmem:[#allocation28] sm:$0xff] }
 0x19d   :  { %v395_v13 = vadd.f32 %v394_v9, %v393_v6  ;;  %v2416_v6 = vld [vmem:[#allocation21] ss:$0 sm:$0xff] }
 0x19e   :  { %v310_v5 = vrot.slane %v309_v61, 2  ;;  %v372_v11 = vrot.slane %v371_v7, 2  ;;  %v348_v12 = vrot.slane %v347_v8, 2 }
 0x19f   :  { %v396_v17 = vrot.slane %v395_v13, 2 }
 0x1a0   :  { %v311_v10 = vadd.f32 %v310_v5, %v309_v61  ;;  %v373_v15 = vadd.f32 %v372_v11, %v371_v7  ;;  %v349_v16 = vadd.f32 %v348_v12, %v347_v8  ;;  %v2414_v8 = vld [vmem:[#allocation18] ss:$0 sm:$0xff]  ;;  %v2412_v11 = vld [vmem:[#allocation16] ss:$0 sm:$0xff] }
 0x1a1   :  { %v397_v21 = vadd.f32 %v396_v17, %v395_v13  ;;  %v2418_v13 = vld [vmem:[#allocation24] ss:$0 sm:$0xff] }
 0x1a2   :  { %v312_v14 = vrot.slane %v311_v10, 1  ;;  %v374_v19 = vrot.slane %v373_v15, 1  ;;  %v350_v20 = vrot.slane %v349_v16, 1 }
 0x1a3   :  { %v398_v25 = vrot.slane %v397_v21, 1 }
 0x1a4   :  { %v313_v18 = vadd.f32 %v312_v14, %v311_v10  ;;  %v375_v23 = vadd.f32 %v374_v19, %v373_v15  ;;  %v351_v24 = vadd.f32 %v350_v20, %v349_v16 }
 0x1a5   :  { %v399_v29 = vadd.f32 %v398_v25, %v397_v21 }
 0x1a6   :  { %v314_v22 = vmul.f32 0.16666667, %v313_v18  ;;  %v376_v27 = vmul.f32 0.125, %v375_v23  ;;  %v352_v28 = vmul.f32 0.125, %v351_v24 }
 0x1a7   :  { %v400_v32 = vmul.f32 0.125, %v399_v29 }
 0x1a8   :  { %v315_v26 = vadd.f32 1e-05, %v314_v22  ;;  %v377_v30 = vadd.f32 1e-05, %v376_v27  ;;  %v353_v31 = vadd.f32 1e-05, %v352_v28 }
 0x1a9   :  { %v401_v33 = vadd.f32 1e-05, %v400_v32  ;;  %v3785_v27 = vld [vmem:[%s3999_s20] sm:$0xff] }
 0x1aa   :  { %2741 = vrsqrt.f32 %v315_v26  ;;  %v2422_v28 = vadd.f32 -1.0, %v3785_v27 }
 0x1ab   :  { %2743 = vrsqrt.f32 %v377_v30 }
 0x1ac   :  { %2745 = vrsqrt.f32 %v353_v31  ;;  %v828_v29 = vmul.f32 1e+30, %v2422_v28 }
 0x1ad   :  { %2747 = vrsqrt.f32 %v401_v33 }
 0x1b4   :  { %v2742_v34 = vpop.eup %2741 }
 0x1b5   :  { %v317_v36 = vmul.f32 %v2742_v34, %v305_v48  ;;  %v2744_v40 = vpop.eup %2743 }
 0x1b6   :  { %v2746_v42 = vpop.eup %2745  ;;  %v379_v45 = vmul.f32 %v2744_v40, %v367_v53 }
 0x1b7   :  { %v324_v41 = vmul.f32 %v2410_v35, %v317_v36  ;;  %v2748_v46 = vpop.eup %2747  ;;  %v355_v50 = vmul.f32 %v2746_v42, %v343_v54  ;;  %v661_v54 = vld [vmem:[#allocation22 + $0x18] sm:$0xff] }
 0x1b8   :  { %v380_v48 = vmul.f32 %v2410_v35, %v379_v45  ;;  %v403_v56 = vmul.f32 %v2748_v46, %v391_v60  ;;  %v2686_v60 = vpack.c.bf16 %v661_v54, %v660_v59  ;;  %v2428_v59 = vadd.f32 -1.0, %v3801_v51 }
 0x1b9   :  { %v3700_v47 = vadd.f32 %v2411_v39, %v324_v41  ;;  %v356_v55 = vmul.f32 %v2410_v35, %v355_v50  ;;  %v3792_v41 = vld [vmem:[#allocation30] sm:$0x3f]  ;;  %v2425_v50 = vadd.f32 -1.0, %v3794_v44 }
 0x1ba   :  { %v3709_v61 = vadd.f32 %v2411_v39, %v380_v48  ;;  %v404_v62 = vmul.f32 %v2410_v35, %v403_v56  ;;  %v2447_v45 = vadd.f32 -1.0, %v3792_v41 }
 0x1bb   :  { %2527 = vmatmul.mubr.msk.f32.vlgmr.msra.gmra.mrb[0].mxu0 %vm333_vm2, %v3700_v47  ;;  %v3707_v53 = vadd.f32 %v2411_v39, %v356_v55 }
 0x1bc   :  { %2678 = vmatpush3.bf16.msra.mxu0 %v2677_v43  ;;  %2548 = vmatprep.mubr.msk.f32.mxu0 %vm3283_vm0, %v3284_v3  ;;  %v3719_v63 = vadd.f32 %v2411_v39, %v404_v62  ;;  %v3803_v52 = vmul.f32 1e+30, %v2447_v45 }
 0x1bd   :  { %2679 = vmatprep.subr.bf16.mxu0 %v3282_v2  ;;  %2538 = vmatmul.mubr.msk.f32.vlgmr.msra.gmra.mrb[0].mxu1 %vm333_vm2, %v3707_v53 }
 0x1be   :  { %2684 = vmatpush3.bf16.msra.mxu1 %v2683_v58  ;;  %2559 = vmatprep.mubr.msk.f32.mxu1 %vm3283_vm0, %v3284_v3  ;;  %v907_v58 = vmul.f32 1e+30, %v2425_v50 }
 0x1bf   :  { %2685 = vmatprep.subr.bf16.mxu1 %v3282_v2 }
 0x1c0   :  { %2681 = vmatpush3.bf16.msra.mxu0 %v2680_v57 }
 0x1c1   :  { %2562 = vmatprep.subr.mxu0 %v3284_v3 }
 0x1c2   :  { %2687 = vmatpush3.bf16.msra.mxu1 %v2686_v60 }
 0x1c3   :  { %2549 = vmatmul.mubr.msk.f32.vlgmr.msra.gmra.mrb[2].mxu0 %vm333_vm2, %v3709_v61  ;;  %2567 = vmatprep.subr.mxu1 %v3284_v3 }
 0x1c4   :  { %2564 = vmatprep.mubr.msk.f32.mxu0 %vm3283_vm0, %v3284_v3 }
 0x1c5   :  { %2560 = vmatmul.mubr.msk.f32.vlgmr.msra.gmra.mrb[2].mxu1 %vm333_vm2, %v3719_v63 }
 0x1c6   :  { %2569 = vmatprep.mubr.msk.f32.mxu1 %vm3283_vm0, %v3284_v3 }
 0x28e   :  { %v486_v0 = vpop.f32.mrb[0].mxu0 }
 0x28f   :  { %v2528_v1 = vpop.f32.mrb[1].mxu0  ;;  %v3732_v15 = vadd.f32 %v2412_v11, %v486_v0 }
 0x290   :  { %v570_v4 = vpop.f32.mrb[0].mxu1  ;;  %v986_v1 = vmul.f32 1e+30, %v2428_v59 }
 0x291   :  { %v2539_v5 = vpop.f32.mrb[1].mxu1  ;;  %v571_v12 = vadd.f32 %v2414_v8, %v570_v4 }
 0x296   :  { %v654_v7 = vpop.f32.mrb[2].mxu0 }
 0x297   :  { %v3728_v9 = vadd.f32 %v2416_v6, %v654_v7  ;;  %v2550_v10 = vpop.f32.mrb[3].mxu0 }
 0x298   :  { %v738_v14 = vpop.f32.mrb[2].mxu1 }
 0x299   :  { %1268 = vrot.lane.b32.xlu1 %v3728_v9, %s3285_s13  ;;  %748 = vrot.lane.b32.xlu0 %v3728_v9, %s3286_s10  ;;  %v2561_v16 = vpop.f32.mrb[3].mxu1  ;;  %v3735_v17 = vadd.f32 %v2418_v13, %v738_v14 }
 0x29d   :  { %1266 = vrot.lane.b32.xlu1 %v571_v12, %s3287_s2  ;;  %910 = vrot.lane.b32.xlu0 %v3732_v15, %s3286_s10 }
 0x2a1   :  { %1422 = vrot.lane.b32.xlu1 %v3732_v15, %s3285_s13  ;;  %1346 = vrot.lane.b32.xlu0 %v3735_v17, %s3285_s13 }
 0x2a5   :  { %831 = vrot.lane.b32.xlu1 %v3735_v17, %s3286_s10  ;;  %1764 = vrot.lane.b32.xlu0 %v571_v12, %s3286_s10 }
 0x2a9   :  { %1856 = vrot.lane.b32.xlu1 %v571_v12, %s3288_s8 }
 0x2ad   :  { %1939 = vrot.lane.b32.xlu1 %v571_v12, %s3285_s13 }
 0x2b1   :  { %1937 = vrot.lane.b32.xlu1 %v3732_v15, %s3287_s2 }
 0x30b   :  { %v1269_v18 = vpop.permute.xlu1 %1268  ;;  %v749_v19 = vpop.permute.xlu0 %748 }
 0x30c   :  { %2563 = vmatpush3.xpose.msk.msra.mxu0 %vm750_vm3, %v749_v19 }
 0x30d   :  { %2572 = vmatprep.subr.mxu0 %v3284_v3 }
 0x30f   :  { %v1267_v20 = vpop.permute.xlu1 %1266  ;;  %2565 = vmatmul.mubr.msk.f32.vlgmr.msra.gmra.mrb[4].mxu0 %vm750_vm3, %v571_v12  ;;  %v911_v21 = vpop.permute.xlu0 %910 }
 0x310   :  { %2573 = vmatpush3.xpose.msk.msra.mxu0 %vm750_vm3, %v911_v21  ;;  %2574 = vmatprep.mubr.msk.f32.mxu0 %vm3283_vm0, %v3284_v3 }
 0x311   :  { %2592 = vmatprep.subr.mxu0 %v3284_v3 }
 0x313   :  { %v1423_v22 = vpop.permute.xlu1 %1422  ;;  %2575 = vmatmul.mubr.msk.f32.vlgmr.msra.gmra.mrb[6].mxu0 %vm750_vm3, %v571_v12  ;;  %v1347_v23 = vpop.permute.xlu0 %1346 }
 0x314   :  { %2593 = vmatpush3.xpose.msk.msra.mxu0 %vm750_vm3, %v1269_v18  ;;  %2594 = vmatprep.mubr.msk.f32.mxu0 %vm3283_vm0, %v3284_v3 }
 0x315   :  { %2597 = vmatprep.subr.mxu0 %v3284_v3 }
 0x317   :  { %v832_v24 = vpop.permute.xlu1 %831  ;;  %2595 = vmatmul.mubr.msk.f32.vlgmr.msra.gmra.mrb[8].mxu0 %vm750_vm3, %v1267_v20  ;;  %v1765_v25 = vpop.permute.xlu0 %1764 }
 0x318   :  { %2568 = vmatpush3.xpose.msk.msra.mxu1 %vm750_vm3, %v832_v24  ;;  %2598 = vmatpush3.xpose.msk.msra.mxu0 %vm750_vm3, %v1347_v23 }
 0x319   :  { %2599 = vmatprep.mubr.msk.f32.mxu0 %vm3283_vm0, %v3284_v3  ;;  %2602 = vmatprep.subr.mxu0 %v3284_v3 }
 0x31a   :  { %2577 = vmatprep.subr.mxu1 %v3284_v3 }
 0x31b   :  { %2570 = vmatmul.mubr.msk.f32.vlgmr.msra.gmra.mrb[4].mxu1 %vm750_vm3, %v571_v12  ;;  %2600 = vmatmul.mubr.msk.f32.vlgmr.msra.gmra.mrb[10].mxu0 %vm750_vm3, %v1267_v20  ;;  %v3774_v26 = vpop.permute.xlu1 %1856 }
 0x31c   :  { %2603 = vmatpush3.xpose.msk.msra.mxu0 %vm750_vm3, %v1423_v22  ;;  %2604 = vmatprep.mubr.msk.f32.mxu0 %vm3283_vm0, %v3284_v3 }
 0x31d   :  { %2622 = vmatprep.subr.mxu0 %v3284_v3  ;;  %2579 = vmatprep.mubr.msk.f32.mxu1 %vm3283_vm0, %v3284_v3 }
 0x31f   :  { %2605 = vmatmul.mubr.msk.f32.vlgmr.msra.gmra.mrb[12].mxu0 %vm750_vm3, %v1267_v20  ;;  %v1940_v18 = vpop.permute.xlu1 %1939 }
 0x320   :  { %2623 = vmatpush3.xpose.msk.msra.mxu0 %vm750_vm3, %v1765_v25  ;;  %2624 = vmatprep.mubr.msk.f32.mxu0 %vm3283_vm0, %v3284_v3 }
 0x321   :  { %2627 = vmatprep.subr.mxu0 %v3284_v3 }
 0x323   :  { %2625 = vmatmul.mubr.msk.f32.vlgmr.msra.gmra.mrb[14].mxu0 %vm750_vm3, %v3732_v15  ;;  %v1938_v19 = vpop.permute.xlu1 %1937 }
 0x324   :  { %2628 = vmatpush3.msra.mxu0 %v3774_v26  ;;  %2629 = vmatprep.mubr.msk.f32.mxu0 %vm3283_vm0, %v3284_v3 }
 0x325   :  { %2632 = vmatprep.subr.mxu0 %v3284_v3 }
 0x3e2   :  { %v822_v30 = vpop.f32.mrb[4].mxu0 }
 0x3e3   :  { %v826_v31 = vmul.f32 0.25, %v822_v30  ;;  %v2566_v32 = vpop.f32.mrb[5].mxu0 }
 0x3e5   :  { %v3788_v33 = vadd.f32 %v828_v29, %v826_v31 }
 0x3e6   :  { %v980_v34 = vpop.f32.mrb[6].mxu0 }
 0x3e7   :  { %v2576_v35 = vpop.f32.mrb[7].mxu0  ;;  %v989_v36 = vsel %vm988_vm4, %v3788_v33, -inf  ;;  %v984_v62 = vmul.f32 0.25, %v980_v34 }
 0x3e8   :  { %990 = vmax.xlane.f32.xlu1 %v989_v36 }
 0x3e9   :  { %v987_v6 = vadd.f32 %v986_v1, %v984_v62 }
 0x3ea   :  { %v1340_v37 = vpop.f32.mrb[8].mxu0 }
 0x3eb   :  { %v2596_v38 = vpop.f32.mrb[9].mxu0  ;;  %v1344_v4 = vmul.f32 0.25, %v1340_v37  ;;  %v997_v8 = vsel %vm996_vm6, %v987_v6, -inf }
 0x3ed   :  { %v3812_v10 = vadd.f32 %v1344_v4, %v828_v29 }
 0x3ee   :  { %v901_v39 = vpop.f32.mrb[4].mxu1  ;;  %v1416_v40 = vpop.f32.mrb[10].mxu0 }
 0x3ef   :  { %v2571_v42 = vpop.f32.mrb[5].mxu1  ;;  %v2601_v43 = vpop.f32.mrb[11].mxu0  ;;  %v905_v55 = vmul.f32 0.25, %v901_v39  ;;  %v1420_v7 = vmul.f32 0.25, %v1416_v40  ;;  %v1498_v12 = vsel %vm988_vm4, %v3812_v10, -inf }
 0x3f1   :  { %v908_v0 = vadd.f32 %v907_v58, %v905_v55  ;;  %v1421_v13 = vadd.f32 %v1420_v7, %v907_v58 }
 0x3f2   :  { %v1492_v46 = vpop.f32.mrb[12].mxu0 }
 0x3f3   :  { %v2606_v49 = vpop.f32.mrb[13].mxu0  ;;  %v992_v5 = vsel %vm988_vm4, %v908_v0, -inf  ;;  %v1496_v11 = vmul.f32 0.25, %v1492_v46  ;;  %v1501_v14 = vsel %vm988_vm4, %v1421_v13, -inf }
 0x3f5   :  { %v1497_v16 = vadd.f32 %v1496_v11, %v986_v1 }
 0x3f6   :  { %v1836_v48 = vpop.f32.mrb[14].mxu0 }
 0x3f7   :  { %v1840_v56 = vmul.f32 0.25, %v1836_v48  ;;  %v2626_v57 = vpop.f32.mrb[15].mxu0 }
 0x3f9   :  { %1017 = vrot.lane.b32.xlu1 %v3735_v17, %s3288_s8  ;;  %v1843_v54 = vadd.f32 %v3803_v52, %v1840_v56  ;;  %v1505_v17 = vsel %vm996_vm6, %v1497_v16, -inf }
 0x3fb   :  { %v1845_v60 = vsel %vm1844_vm5, %v1843_v54, -inf }
 0x3fc   :  { %1846 = vmax.xlane.f32.xlu0 %v1845_v60 }
 0x400   :  { %993 = vmax.xlane.f32.xlu0 %v992_v5 }
 0x404   :  { %998 = vmax.xlane.f32.xlu0 %v997_v8 }
 0x408   :  { %1499 = vmax.xlane.f32.xlu0 %v1498_v12 }
 0x40c   :  { %1502 = vmax.xlane.f32.xlu0 %v1501_v14 }
 0x410   :  { %1506 = vmax.xlane.f32.xlu0 %v1505_v17 }
 0x426   :  { %1093 = vrot.lane.b32.xlu0 %v3728_v9, %s3288_s8 }
 0x42a   :  { %1177 = vrot.lane.b32.xlu0 %v3732_v15, %s3288_s8 }
 0x475   :  { %v991_v20 = vpop.xlane.xlu1 %990 }
 0x479   :  { %v3822_v21 = vpop.permute.xlu1 %1017 }
 0x47a   :  { %2578 = vmatpush3.msra.mxu1 %v3822_v21 }
 0x47b   :  { %2582 = vmatprep.subr.mxu1 %v3284_v3 }
 0x489   :  { %v1847_v22 = vpop.xlane.xlu0 %1846 }
 0x48a   :  { %v1848_v23 = vsub.f32 %v1843_v54, %v1847_v22 }
 0x48c   :  { %v1849_v24 = vmul.f32 1.442695, %v1848_v23 }
 0x48d   :  { %v994_v25 = vpop.xlane.xlu0 %993 }
 0x48e   :  { %2749 = vpow2.f32 %v1849_v24  ;;  %v995_v28 = vmax.f32 %v991_v20, %v994_v25 }
 0x491   :  { %v999_v29 = vpop.xlane.xlu0 %998 }
 0x492   :  { %v1000_v9 = vmax.f32 %v995_v28, %v999_v29 }
 0x494   :  { %v1001_v30 = vsub.f32 %v3788_v33, %v1000_v9  ;;  %v1009_v15 = vsub.f32 %v908_v0, %v1000_v9  ;;  %v1169_v40 = vsub.f32 %v987_v6, %v1000_v9  ;;  %v2115_v9 = vld [vmem:[#allocation25] sm:$0xff] }
 0x495   :  { %v1500_v31 = vpop.xlane.xlu0 %1499 }
 0x496   :  { %v1002_v32 = vmul.f32 1.442695, %v1001_v30  ;;  %v1010_v34 = vmul.f32 1.442695, %v1009_v15  ;;  %v1170_v48 = vmul.f32 1.442695, %v1169_v40 }
 0x497   :  { %v2116_v30 = vld [vmem:[#allocation25 + $0x8] sm:$0xff]  ;;  %v2117_v15 = vld [vmem:[#allocation25 + $0x10] sm:$0xff] }
 0x498   :  { %v2750_v35 = vpop.eup %2749  ;;  %2751 = vpow2.f32 %v1002_v32  ;;  %v2118_v32 = vld [vmem:[#allocation25 + $0x18] sm:$0xff] }
 0x499   :  { %2753 = vpow2.f32 %v1010_v34  ;;  %v1503_v36 = vpop.xlane.xlu0 %1502  ;;  %v3828_v37 = vmul.f32 %v2750_v35, %v3792_v41  ;;  %v2692_v34 = vpack.c.bf16 %v2118_v32, %v2117_v15 }
 0x49a   :  { %v1504_v38 = vmax.f32 %v1500_v31, %v1503_v36  ;;  %v2689_v31 = vpack.c.bf16 %v2116_v30, %v2115_v9 }
 0x49b   :  { %2630 = vmatmul.mubr.msk.f32.vlgmr.msra.gmra.mrb[16].mxu0 %vm988_vm4, %v3828_v37  ;;  %v1852_v23 = vsel %vm1844_vm5, %v3828_v37, 0.0  ;;  %v2199_v37 = vld [vmem:[#allocation2] sm:$0x1] }
 0x49c   :  { %2633 = vmatpush3.xpose.msk.msra.mxu0 %vm750_vm3, %v1940_v18  ;;  %2634 = vmatprep.mubr.msk.f32.mxu0 %vm3283_vm0, %v3284_v3 }
 0x49d   :  { %v1507_v33 = vpop.xlane.xlu0 %1506  ;;  %2688 = vmatprep.subr.bf16.mxu0 %v3282_v2 }
 0x49e   :  { %v1508_v39 = vmax.f32 %v1504_v38, %v1507_v33  ;;  %v3289_v38 = vmov 0  }
 0x49f   :  { %2635 = vmatmul.mubr.msk.f32.vlgmr.msra.gmra.mrb[18].mxu0 %vm750_vm3, %v1938_v19  ;;  %2740 = vset.pattern.permute.xlu0 %v3289_v38 }
 0x4a0   :  { %v1517_v42 = vsub.f32 %v1421_v13, %v1508_v39  ;;  %v1671_v43 = vsub.f32 %v1497_v16, %v1508_v39  ;;  %2650 = vmatprep.mubr.msk.f32.mxu0 %vm3283_vm0, %v3284_v3  ;;  %v1509_v59 = vsub.f32 %v3812_v10, %v1508_v39  ;;  %v745_v10 = vlaneseq  ;;  %2690 = vmatpush3.bf16.msra.mxu0 %v2689_v31 }
 0x4a1   :  { %v1094_v58 = vpop.permute.xlu0 %1093  ;;  %2691 = vmatprep.subr.bf16.mxu0 %v3282_v2  ;;  %2739 = vset.pattern.permute.xlu1 %v3289_v38 }
 0x4a2   :  { %v2752_v45 = vpop.eup %2751  ;;  %v1518_v46 = vmul.f32 1.442695, %v1517_v42  ;;  %v1672_v49 = vmul.f32 1.442695, %v1671_v43  ;;  %v1510_v60 = vmul.f32 1.442695, %v1509_v59 }
 0x4a3   :  { %v2754_v50 = vpop.eup %2753  ;;  %v1004_v55 = vmul.f32 %v2752_v45, %v3785_v27  ;;  %v2202_v35 = vshrl.u32 %v745_v10, 7 }
 0x4a4   :  { %v1012_v56 = vmul.f32 %v2754_v50, %v3794_v44  ;;  %2755 = vpow2.f32 %v1518_v46  ;;  %2693 = vmatpush3.bf16.msra.mxu0 %v2692_v34 }
 0x4a5   :  { %v1005_v57 = vsel %vm988_vm4, %v1004_v55, 0.0  ;;  %2757 = vpow2.f32 %v1672_v49  ;;  %v1178_v54 = vpop.permute.xlu0 %1177  ;;  %v3891_v36 = vsub.s32 0, %v2202_v35 }
 0x4a6   :  { %2580 = vmatmul.mubr.msk.f32.vlgmr.msra.gmra.mrb[6].mxu1 %vm988_vm4, %v1012_v56  ;;  %1006 = vadd.xlane.f32.xlu0 %v1005_v57  ;;  %2759 = vpow2.f32 %v1170_v48  ;;  %v1013_v20 = vsel %vm988_vm4, %v1012_v56, 0.0 }
 0x4a7   :  { %2583 = vmatpush3.msra.mxu1 %v1094_v58  ;;  %2584 = vmatprep.mubr.msk.f32.mxu1 %vm3283_vm0, %v3284_v3  ;;  %2761 = vpow2.f32 %v1510_v60  ;;  %v2204_v33 = vrot.slane %v2199_v37, %v3891_v36 }
 0x4a8   :  { %2587 = vmatprep.subr.mxu1 %v3284_v3 }
 0x4ae   :  { %2585 = vmatmul.mubr.msk.f32.vlgmr.msra.gmra.mrb[6].mxu1 %vm988_vm4, %v1004_v55  ;;  %v2756_v62 = vpop.eup %2755 }
 0x4af   :  { %2588 = vmatpush3.msk.msra.mxu1 %vm1182_vm7, %v1178_v54  ;;  %2589 = vmatprep.mubr.msk.f32.mxu1 %vm3283_vm0, %v3284_v3  ;;  %v2758_v0 = vpop.eup %2757  ;;  %v1520_v1 = vmul.f32 %v2756_v62, %v3794_v44 }
 0x4b0   :  { %2607 = vmatprep.subr.mxu1 %v3284_v3  ;;  %v2760_v4 = vpop.eup %2759  ;;  %v1674_v6 = vmul.f32 %v2758_v0, %v3801_v51 }
 0x4b1   :  { %v1521_v5 = vsel %vm988_vm4, %v1520_v1, 0.0  ;;  %v1172_v7 = vmul.f32 %v2760_v4, %v3801_v51  ;;  %v2762_v44 = vpop.eup %2761 }
 0x4b2   :  { %1522 = vadd.xlane.f32.xlu0 %v1521_v5  ;;  %v1675_v8 = vsel %vm996_vm6, %v1674_v6, 0.0  ;;  %v1512_v51 = vmul.f32 %v2762_v44, %v3785_v27  ;;  %v3877_v27 = vand.u32 127, %v745_v10 }
 0x4b3   :  { %v1173_v22 = vsel %vm996_vm6, %v1172_v7, 0.0 }
 0x4b4   :  { %vm1257_vm8 = vcmp.lt.s32.totalorder %v3877_v27, 16  ;;  %vm1753_vm9 = vcmp.ge.s32.totalorder %v3877_v27, 16  ;;  %vm1754_vm10 = vcmp.lt.s32.totalorder %v3877_v27, 32 }
 0x4b5   :  { %v2433_v11 = vsel %vm1257_vm8, 1.0, %v3284_v3  ;;  %vm1755_vm11 = vmand %vm1753_vm9, %vm1754_vm10 }
 0x4b6   :  { %2590 = vmatmul.mubr.msk.f32.vlgmr.msra.gmra.mrb[6].mxu1 %vm996_vm6, %v1172_v7  ;;  %1676 = vadd.xlane.f32.xlu0 %v1675_v8 }
 0x4b7   :  { %2608 = vmatpush3.msra.mxu1 %v3822_v21  ;;  %2609 = vmatprep.mubr.msk.f32.mxu1 %vm3283_vm0, %v3284_v3  ;;  %v1513_v21 = vsel %vm988_vm4, %v1512_v51, 0.0 }
 0x4b8   :  { %2612 = vmatprep.subr.mxu1 %v3284_v3 }
 0x4ba   :  { %2610 = vmatmul.mubr.msk.f32.vlgmr.msra.gmra.mrb[8].mxu1 %vm988_vm4, %v1520_v1  ;;  %v2444_v1 = vsel %vm1755_vm11, 1.0, %v3284_v3 }
 0x4bb   :  { %2613 = vmatpush3.msra.mxu1 %v1094_v58  ;;  %2614 = vmatprep.mubr.msk.f32.mxu1 %vm3283_vm0, %v3284_v3 }
 0x4bc   :  { %2617 = vmatprep.subr.mxu1 %v3284_v3 }
 0x4c2   :  { %2615 = vmatmul.mubr.msk.f32.vlgmr.msra.gmra.mrb[8].mxu1 %vm988_vm4, %v1512_v51  ;;  %v2210_v51 = vsub.f32 1.0, %v2199_v37 }
 0x4c3   :  { %2618 = vmatpush3.msk.msra.mxu1 %vm1182_vm7, %v1178_v54  ;;  %2619 = vmatprep.mubr.msk.f32.mxu1 %vm3283_vm0, %v3284_v3 }
 0x4c4   :  { %2637 = vmatprep.subr.mxu1 %v3284_v3 }
 0x4ca   :  { %2620 = vmatmul.mubr.msk.f32.vlgmr.msra.gmra.mrb[8].mxu1 %vm996_vm6, %v1674_v6 }
 0x4cb   :  { %2638 = vmatpush3.msra.mxu1 %v3774_v26  ;;  %2639 = vmatprep.mubr.msk.f32.mxu1 %vm3283_vm0, %v3284_v3 }
 0x4cc   :  { %2694 = vmatprep.subr.bf16.mxu1 %v3282_v2 }
 0x533   :  { %v1007_v39 = vpop.xlane.xlu0 %1006 }
 0x53f   :  { %v1523_v45 = vpop.xlane.xlu0 %1522 }
 0x543   :  { %v1677_v48 = vpop.xlane.xlu0 %1676 }
 0x56e   :  { %v1928_v12 = vpop.f32.mrb[16].mxu0 }
 0x56f   :  { %v3881_v13 = vmul.f32 %v2433_v11, %v1928_v12  ;;  %v2631_v14 = vpop.f32.mrb[17].mxu0 }
 0x572   :  { %v2011_v16 = vpop.f32.mrb[18].mxu0 }
 0x573   :  { %v2015_v17 = vmul.f32 0.25, %v2011_v16  ;;  %v2636_v18 = vpop.f32.mrb[19].mxu0 }
 0x575   :  { %v2016_v26 = vadd.f32 %v2015_v17, %v3803_v52 }
 0x577   :  { %v2017_v19 = vsel %vm1844_vm5, %v2016_v26, -inf }
 0x578   :  { %2018 = vmax.xlane.f32.xlu1 %v2017_v19  ;;  %v2232_v19 = vld [vmem:[%s3996_s16 + $0x8] sm:$0xff] }
 0x57c   :  { %1014 = vadd.xlane.f32.xlu1 %v1013_v20  ;;  %v2233_v20 = vld [vmem:[%s3996_s16 + $0x10] sm:$0xff] }
 0x580   :  { %1514 = vadd.xlane.f32.xlu1 %v1513_v21 }
 0x584   :  { %1174 = vadd.xlane.f32.xlu1 %v1173_v22  ;;  %v2234_v22 = vld [vmem:[%s3996_s16 + $0x18] sm:$0xff] }
 0x588   :  { %1853 = vadd.xlane.f32.xlu1 %v1852_v23  ;;  %v2698_v23 = vpack.c.bf16 %v2234_v22, %v2233_v20 }
 0x589   :  { %v1251_v24 = vpop.f32.mrb[6].mxu1 }
 0x58a   :  { %v1261_v25 = vmul.f32 %v2433_v11, %v1251_v24  ;;  %v2591_v28 = vpop.f32.mrb[7].mxu1  ;;  %v2215_v11 = vrot.slane %v2210_v51, %v3891_v36  ;;  %v2315_v24 = vld [vmem:[#allocation3] sm:$0x1] }
 0x58b   :  { %v2326_v28 = vsub.f32 1.0, %v2315_v24 }
 0x599   :  { %2206 = vperm.xlu1 %2739, %v2204_v33  }
 0x59d   :  { %v1748_v52 = vpop.f32.mrb[8].mxu1 }
 0x59e   :  { %v2621_v29 = vpop.f32.mrb[9].mxu1  ;;  %v1758_v5 = vmul.f32 %v2444_v1, %v1748_v52  ;;  %v2331_v52 = vrot.slane %v2326_v28, %v3891_v36 }
 0x605   :  { %v2019_v40 = vpop.xlane.xlu1 %2018 }
 0x606   :  { %v2020_v42 = vsub.f32 %v2016_v26, %v2019_v40  ;;  %v2231_v26 = vld [vmem:[%s3996_s16] sm:$0xff]  ;;  %s3290_s16 = smov [#allocation32]  }
 0x607   :  { %v2695_v21 = vpack.c.bf16 %v2232_v19, %v2231_v26  ;;  %s2362_s23 = sshll.u32 %s3290_s16, 4  ;;  %s2363_s23 = int_to_ptr.vmem [resolvable:$true] %s2362_s23 }
 0x608   :  { %v2021_v43 = vmul.f32 1.442695, %v2020_v42  ;;  %s3151_s9 = scalar_lea.vmem %s2363_s23, 128  ;;  %p3156_p11 = scmp.lt.s32.totalorder %s2363_s23, %s2363_s23 }
 0x609   :  { %v1015_v46 = vpop.xlane.xlu1 %1014  ;;  %p3152_p10 = scmp.ne.s32.totalorder %s2363_s23, %s3151_s9  ;;  %p3157_p12 = scmp.lt.s32.totalorder %s3151_s9, %s3151_s9 }
 0x60a   :  { %2763 = vpow2.f32 %v2021_v43  ;;  %v1016_v55 = vadd.f32 %v1015_v46, %v1007_v39 }
 0x60b   :  { %p3158_p13 = por %p3157_p12, %p3156_p11 }
 0x60d   :  { %v1515_v49 = vpop.xlane.xlu1 %1514  ;;  %p3159_p0 = pnand %p3158_p13, %p3152_p10 }
 0x60e   :  { %v1524_v50 = vadd.f32 %v1523_v45, %v1515_v49 }
 0x610   :  { %v1678_v56 = vadd.f32 %v1677_v48, %v1524_v50  ;;  %v2452_v48 = vld [vmem:[#allocation27] ss:$0 sm:$0xff] }
 0x611   :  { %v1175_v57 = vpop.xlane.xlu1 %1174 }
 0x612   :  { %v1759_v58 = vmax.f32 %v1678_v56, 1e-20  ;;  %v1176_v59 = vadd.f32 %v1175_v57, %v1016_v55 }
 0x614   :  { %v2764_v54 = vpop.eup %2763  ;;  %2765 = vrcp.f32 %v1759_v58  ;;  %v1262_v62 = vmax.f32 %v1176_v59, 1e-20 }
 0x615   :  { %v2023_v60 = vmul.f32 %v2764_v54, %v3792_v41  ;;  %v1854_v29 = vpop.xlane.xlu1 %1853 }
 0x616   :  { %2767 = vrcp.f32 %v1262_v62  ;;  %v1933_v30 = vmax.f32 %v1854_v29, 1e-20 }
 0x617   :  { %2640 = vmatmul.mubr.msk.f32.vlgmr.msra.gmra.mrb[10].mxu1 %vm988_vm4, %v2023_v60  ;;  %v2024_v0 = vsel %vm1844_vm5, %v2023_v60, 0.0 }
 0x618   :  { %2025 = vadd.xlane.f32.xlu0 %v2024_v0  ;;  %2661 = vmatprep.mubr.msk.f32.mxu1 %vm3283_vm0, %v3284_v3  ;;  %v2342_v0 = vmax.f32 %v3709_v61, 0.0 }
 0x619   :  { %2696 = vmatpush3.bf16.msra.mxu1 %v2695_v21  ;;  %v2207_v57 = vpop.permute.xlu1 %2206 }
 0x61a   :  { %2697 = vmatprep.subr.bf16.mxu1 %v3282_v2 }
 0x61d   :  { %2699 = vmatpush3.bf16.msra.mxu1 %v2698_v23 }
 0x61e   :  { %v2766_v4 = vpop.eup %2765 }
 0x61f   :  { %v1761_v41 = vmul.f32 %v2766_v4, %v1758_v5 }
 0x620   :  { %v2768_v6 = vpop.eup %2767 }
 0x621   :  { %v1264_v7 = vmul.f32 %v2768_v6, %v1261_v25  ;;  %v2320_v25 = vrot.slane %v2315_v24, %v3891_v36 }
 0x623   :  { %v1762_v8 = vadd.f32 %v1761_v41, %v1264_v7  ;;  %2322 = vperm.xlu1 %2739, %v2320_v25  }
 0x625   :  { %v2106_v44 = vmul.f32 %v1762_v8, %v1762_v8 }
 0x627   :  { %v2107_v10 = vmul.f32 %v2106_v44, %v1762_v8  ;;  %2333 = vperm.xlu1 %2739, %v2331_v52  }
 0x629   :  { %v2108_v27 = vmul.f32 0.044715, %v2107_v10 }
 0x62b   :  { %v2109_v12 = vadd.f32 %v2108_v27, %v1762_v8 }
 0x62d   :  { %v2110_v14 = vmul.f32 0.7978846, %v2109_v12 }
 0x62e   :  { %2217 = vperm.xlu0 %2740, %v2215_v11  }
 0x62f   :  { %2769 = vtanh.f32 %v2110_v14 }
 0x630   :  { %2771 = vrcp.f32 %v1933_v30 }
 0x639   :  { %v2770_v16 = vpop.eup %2769 }
 0x63a   :  { %v2112_v17 = vadd.f32 1.0, %v2770_v16  ;;  %v2772_v31 = vpop.eup %2771 }
 0x63b   :  { %v1935_v37 = vmul.f32 %v2772_v31, %v3881_v13 }
 0x63c   :  { %v2113_v18 = vmul.f32 0.5, %v2112_v17 }
 0x63e   :  { %v2114_v3 = vmul.f32 %v2113_v18, %v1762_v8 }
 0x640   :  { %2651 = vmatmul.mubr.msk.f32.vlgmr.msra.gmra.mrb[20].mxu0 %vm333_vm2, %v2114_v3 }
 0x6a5   :  { %v2026_v9 = vpop.xlane.xlu0 %2025 }
 0x6a6   :  { %v2102_v15 = vmax.f32 %v2026_v9, 1e-20 }
 0x6a8   :  { %2773 = vrcp.f32 %v2102_v15 }
 0x6ad   :  { %v2218_v55 = vpop.permute.xlu0 %2217 }
 0x6ae   :  { %v2220_v59 = vmul.f32 %v2218_v55, %v3707_v53 }
 0x6b2   :  { %v2774_v2 = vpop.eup %2773 }
 0x6ea   :  { %v2097_v32 = vpop.f32.mrb[10].mxu1 }
 0x6eb   :  { %v2101_v34 = vmul.f32 %v2444_v1, %v2097_v32  ;;  %v2641_v35 = vpop.f32.mrb[11].mxu1  ;;  %v2344_v1 = vmax.f32 %v3719_v63, 0.0 }
 0x6ed   :  { %v2104_v38 = vmul.f32 %v2774_v2, %v2101_v34 }
 0x6ef   :  { %v2105_v33 = vadd.f32 %v2104_v38, %v1935_v37 }
 0x6f1   :  { %v2222_v39 = vmul.f32 %v2105_v33, %v2105_v33 }
 0x6f3   :  { %v2223_v40 = vmul.f32 %v2222_v39, %v2105_v33 }
 0x6f5   :  { %v2224_v42 = vmul.f32 0.044715, %v2223_v40 }
 0x6f7   :  { %v2225_v36 = vadd.f32 %v2224_v42, %v2105_v33 }
 0x6f9   :  { %v2226_v43 = vmul.f32 0.7978846, %v2225_v36 }
 0x6fb   :  { %2775 = vtanh.f32 %v2226_v43 }
 0x705   :  { %v2776_v45 = vpop.eup %2775 }
 0x706   :  { %v2228_v46 = vadd.f32 1.0, %v2776_v45 }
 0x708   :  { %v2229_v49 = vmul.f32 0.5, %v2228_v46 }
 0x70a   :  { %v2230_v50 = vmul.f32 %v2229_v49, %v2105_v33 }
 0x70c   :  { %2662 = vmatmul.mubr.msk.f32.vlgmr.msra.gmra.mrb[12].mxu1 %vm333_vm2, %v2230_v50 }
 0x713   :  { %v2195_v56 = vpop.f32.mrb[20].mxu0 }
 0x714   :  { %v2196_v58 = vadd.f32 %v2452_v48, %v2195_v56  ;;  %v2652_v13 = vpop.f32.mrb[21].mxu0 }
 0x716   :  { %v2209_v54 = vmul.f32 %v2207_v57, %v2196_v58 }
 0x718   :  { %v2221_v62 = vadd.f32 %v2220_v59, %v2209_v54 }
 0x71a   :  { %v2340_v60 = vmax.f32 %v2221_v62, 0.0 }
 0x71c   :  { %2341 = vst.msk [vmem:[#allocation32] sm:$0xff] %vm333_vm2, %v2340_v60 }
 0x71d   :  { %3162 = shalt.err (!%p3159_p0)
}
 0x71e   :  { %s3163_s5 = scalar_lea.hbm %s4004_s25, 128 }
 0x71f   :  { %p3164_p1 = scmp.ne.s32.totalorder %s4004_s25, %s3163_s5  ;;  %p3167_p2 = scmp.lt.u32.totalorder %s3163_s5, %s4004_s25 }
 0x721   :  { %p3169_p3 = pnand %p3167_p2, %p3164_p1 }
 0x723   :  { %3172 = shalt.err (!%p3169_p3)
}
 0x724   :  { %2365 = dma.vmem_to_hbm [thread:$0]  %s2363_s23, 128, %s4004_s25, [#allocation33]   ;;  %2343 = vst.msk [vmem:[#allocation34] sm:$0xff] %vm333_vm2, %v2342_v0  ;;  %2345 = vst.msk [vmem:[#allocation35] sm:$0xff] %vm333_vm2, %v2344_v1 }
 0x725   :  { %s3291_s2 = smov [#allocation34]   ;;  %s3292_s19 = smov [#allocation35]  }
 0x726   :  { %s2372_s8 = sshll.u32 %s3291_s2, 4  ;;  %s2382_s11 = sshll.u32 %s3292_s19, 4  ;;  %s2373_s8 = int_to_ptr.vmem [resolvable:$true] %s2372_s8  ;;  %s2383_s11 = int_to_ptr.vmem [resolvable:$true] %s2382_s11 }
 0x727   :  { %s3173_s20 = scalar_lea.vmem %s2373_s8, 128  ;;  %p3178_p5 = scmp.lt.s32.totalorder %s2373_s8, %s2373_s8 }
 0x728   :  { %p3174_p4 = scmp.ne.s32.totalorder %s2373_s8, %s3173_s20  ;;  %p3179_p6 = scmp.lt.s32.totalorder %s3173_s20, %s3173_s20 }
 0x72a   :  { %p3180_p7 = por %p3179_p6, %p3178_p5 }
 0x72c   :  { %p3181_p8 = pnand %p3180_p7, %p3174_p4 }
 0x72e   :  { %3184 = shalt.err (!%p3181_p8)
}
 0x72f   :  { %s3185_s25 = scalar_lea.hbm %s4005_s26, 128 }
 0x730   :  { %p3186_p9 = scmp.ne.s32.totalorder %s4005_s26, %s3185_s25  ;;  %p3189_p10 = scmp.lt.u32.totalorder %s3185_s25, %s4005_s26 }
 0x732   :  { %p3191_p11 = pnand %p3189_p10, %p3186_p9 }
 0x734   :  { %3194 = shalt.err (!%p3191_p11)
}
 0x735   :  { %2375 = dma.vmem_to_hbm [thread:$0]  %s2373_s8, 128, %s4005_s26, [#allocation33]  }
 0x736   :  { %s3195_s3 = scalar_lea.vmem %s2383_s11, 128  ;;  %p3200_p13 = scmp.lt.s32.totalorder %s2383_s11, %s2383_s11 }
 0x737   :  { %p3196_p12 = scmp.ne.s32.totalorder %s2383_s11, %s3195_s3  ;;  %p3201_p0 = scmp.lt.s32.totalorder %s3195_s3, %s3195_s3 }
 0x739   :  { %p3202_p1 = por %p3201_p0, %p3200_p13 }
 0x73b   :  { %p3203_p2 = pnand %p3202_p1, %p3196_p12 }
 0x73d   :  { %3206 = shalt.err (!%p3203_p2)
}
 0x73e   :  { %s3207_s9 = scalar_lea.hbm %s4006_s27, 128 }
 0x73f   :  { %p3208_p3 = scmp.ne.s32.totalorder %s4006_s27, %s3207_s9  ;;  %p3211_p4 = scmp.lt.u32.totalorder %s3207_s9, %s4006_s27 }
 0x741   :  { %p3213_p5 = pnand %p3211_p4, %p3208_p3 }
 0x743   :  { %3216 = shalt.err (!%p3213_p5)
}
 0x744   :  { %2385 = dma.vmem_to_hbm [thread:$0]  %s2383_s11, 128, %s4006_s27, [#allocation36]   ;;  %v2323_v53 = vpop.permute.xlu1 %2322  ;;  %v2454_v61 = vld [vmem:[%s3997_s17] ss:$0 sm:$0xff] }
 0x745   :  { %s3293_s13 = smov [#allocation31]  }
 0x746   :  { %s2352_s10 = sshll.u32 %s3293_s13, 4  ;;  %s2353_s10 = int_to_ptr.vmem [resolvable:$true] %s2352_s10 }
 0x747   :  { %s3217_s27 = scalar_lea.vmem %s2353_s10, 128  ;;  %p3222_p7 = scmp.lt.s32.totalorder %s2353_s10, %s2353_s10 }
 0x748   :  { %v2334_v63 = vpop.permute.xlu1 %2333  ;;  %p3218_p6 = scmp.ne.s32.totalorder %s2353_s10, %s3217_s27  ;;  %p3223_p8 = scmp.lt.s32.totalorder %s3217_s27, %s3217_s27 }
 0x749   :  { %v2336_v41 = vmul.f32 %v2334_v63, %v3700_v47 }
 0x74a   :  { %p3224_p9 = por %p3223_p8, %p3222_p7 }
 0x74c   :  { %p3225_p10 = pnand %p3224_p9, %p3218_p6 }
 0x7df   :  { %v2311_v4 = vpop.f32.mrb[12].mxu1 }
 0x7e0   :  { %v2312_v5 = vadd.f32 %v2454_v61, %v2311_v4  ;;  %v2663_v6 = vpop.f32.mrb[13].mxu1 }
 0x7e2   :  { %v2325_v7 = vmul.f32 %v2323_v53, %v2312_v5 }
 0x7e4   :  { %v2337_v8 = vadd.f32 %v2336_v41, %v2325_v7 }
 0x7e6   :  { %v2338_v44 = vmax.f32 %v2337_v8, 0.0 }
 0x7e8   :  { %2339 = vst.msk [vmem:[#allocation31] sm:$0x3f] %vm295_vm1, %v2338_v44 }
 0x7e9   :  { %3228 = shalt.err (!%p3225_p10)
}
 0x7ea   :  { %s3229_s8 = scalar_lea.hbm %s4003_s24, 128 }
 0x7eb   :  { %p3230_p11 = scmp.ne.s32.totalorder %s4003_s24, %s3229_s8  ;;  %p3233_p12 = scmp.lt.u32.totalorder %s3229_s8, %s4003_s24 }
 0x7ed   :  { %p3235_p13 = pnand %p3233_p12, %p3230_p11 }
 0x7ef   :  { %3238 = shalt.err (!%p3235_p13)
}
 0x7f0   :  { %2355 = dma.vmem_to_hbm [thread:$0]  %s2353_s10, 128, %s4003_s24, [#allocation6]  }
 0x7f1   :  { %3257 = dma.done.wait [#allocation6], 128  }
 0x7f2   :  { %3258 = vsyncadd [#allocation6], 4294967168 }
 0x7f3   :  { %3259 = dma.done.wait [#allocation33], 256  }
 0x7f4   :  { %3260 = vsyncadd [#allocation33], 4294967040 }
 0x7f5   :  { %3261 = dma.done.wait [#allocation36], 128  }
 0x7f6   :  { %3262 = vsyncadd [#allocation36], 4294967168 }
 0x7f7   :  { %2398 = vsyncpa [#allocation5], 1 }
 0x7f8   :  { %2399 = vsyncpa [#allocation8], 1 }
 0x7f9   :  { %2400 = vsyncpa [#allocation11], 1 }
 0x7fa   :  { %2401 = vsyncpa [#allocation14], 1 }
 0x7fb   :  { %2402 = vsyncpa [#allocation17], 1 }
 0x7fc   :  { %2403 = vsyncpa [#allocation20], 1 }
 0x7fd   :  { %2404 = vsyncpa [#allocation23], 1 }
 0x7fe   :  { %2405 = vsyncpa [#allocation26], 1 }
 0x7ff   :  { %2406 = vsyncpa [#allocation29], 1 }
 0x800   :  { %2407 = vsyncpa [#allocation6], 1 }
 0x801   :  { %2408 = vsyncpa [#allocation33], 1 }
 0x802   :  { %2409 = vsyncpa [#allocation36], 1 }

</bundles_post_ra>
